<compile_context>
chip_gen: v5e
topology: v5e:2x2
jax: 0.10.0
libtpu: 0.0.40
codegen_flags: <defaults>
</compile_context>

<pallas_src>
import functools

import jax
import jax.numpy as jnp
from jax.experimental import pallas as pl
from jax.experimental.pallas import tpu as pltpu

_SQRT2 = 1.4142135623730951


def _gelu_exact(x):
    # PyTorch F.gelu default (erf-based, exact).
    return 0.5 * x * (1.0 + jax.lax.erf(x / _SQRT2))


def star2_kernel(x_ref, w13_ref, b1_ref, w2_ref, b2_ref, w3b_ref, b3_ref,
                 w4_ref, b4_ref, out_ref, core_ref, *, channels, d_series, d_core):
    md = w13_ref.dtype                     # matmul operand dtype (f32 / bf16)
    cd = channels * d_series

    x = x_ref[...]                         # (rows, C*D), already matmul dtype

    # Fused x-projections against block-diag [w1 | w3a]: (rows, 2*C*D), f32 acc.
    p13 = jnp.dot(x, w13_ref[...], preferred_element_type=jnp.float32)
    h1 = _gelu_exact(p13[:, :cd] + b1_ref[...])      # per-channel gen1 + GELU
    x_w3a = p13[:, cd:]                              # per-channel x @ w3a

    # gen2 (block-diag w2): (rows, C*K) f32.
    h2 = jnp.dot(h1.astype(md), w2_ref[...],
                 preferred_element_type=jnp.float32) + b2_ref[...]

    # Per-window channel-softmax pooled core via static lane-group slices:
    #   core = sum_c h2_c * exp(h2_c - m) / sum_c exp(h2_c - m),  m = max_c h2_c
    h2c = [h2[:, c * d_core:(c + 1) * d_core] for c in range(channels)]
    m = h2c[0]
    for c in range(1, channels):
        m = jnp.maximum(m, h2c[c])
    num = jnp.zeros_like(m)
    den = jnp.zeros_like(m)
    for c in range(channels):
        e = jnp.exp(h2c[c] - m)
        num = num + h2c[c] * e
        den = den + e
    core = num / den                                  # (rows, K) f32

    # gen3: the broadcast of the core term over the C channels is folded into
    # the lane-tiled w3b (K, C*D), so no materialised (rows, C*D) broadcast.
    cterm = jnp.dot(core.astype(md), w3b_ref[...],
                    preferred_element_type=jnp.float32)
    h3 = _gelu_exact(x_w3a + cterm + b3_ref[...])

    # gen4 (block-diag w4).
    y = jnp.dot(h3.astype(md), w4_ref[...],
                preferred_element_type=jnp.float32) + b4_ref[...]

    out_ref[...] = y.astype(out_ref.dtype)
    core_ref[...] = core


def _block_diag(w, c):
    """(din, dout) -> (c*din, c*dout) with w on the diagonal blocks."""
    din, dout = w.shape
    eye = jnp.eye(c, dtype=w.dtype)
    return (eye[:, None, :, None] * w[None, :, None, :]).reshape(c * din, c * dout)


def _tpu_plan():
    """(vmem tile budget, min grid blocks, vmem_limit_bytes) per generation."""
    try:
        kind = jax.devices()[0].device_kind.lower()
    except Exception:
        kind = ""
    if "7" in kind:                    # v7x: 64 MiB VMEM shared by 2 TensorCores
        return 3 << 20, 2, 32 << 20
    return 6 << 20, 1, 64 << 20        # v5e / v6e: 128 MiB VMEM, single TC


def _plan_row_blocks(bw, row_bytes, vmem_tile_budget, min_blocks):
    """Windows (rows) per grid block; returns (padded_rows, rows_per_block)."""
    max_rows = max(8, (vmem_tile_budget // max(row_bytes, 1)) // 8 * 8)
    # Single largest block when one TensorCore handles everything anyway.
    if min_blocks <= 1 and bw <= max_rows:
        return bw, bw
    # Prefer an 8-aligned divisor of bw that fits the budget and gives at
    # least `min_blocks` grid steps.
    best = None
    for wpb in range(8, min(bw, max_rows) + 1, 8):
        if bw % wpb == 0 and bw // wpb >= min_blocks:
            best = wpb
    if best is not None:
        return bw, best
    # No suitable divisor: pad the row dim to a multiple of an 8-aligned block
    # size with minimal padding.
    n_blocks = max(min_blocks, -(-bw // max_rows), 1)
    wpb = max(8, -(-bw // (n_blocks * 8)) * 8)
    bw_pad = -(-bw // wpb) * wpb
    return bw_pad, wpb


def star2_forward(x, params, matmul_dtype=jnp.bfloat16, out_dtype=jnp.float32):
    """x: (B, W, C, D) float32. Returns (output (B, W, C, D), core (B, W, K))."""
    B, W, C, D = x.shape
    K = params["w2"].shape[1]
    BW = B * W
    CD = C * D
    CK = C * K

    budget, min_blocks, vmem_limit = _tpu_plan()
    in_sz = jnp.dtype(matmul_dtype).itemsize
    out_sz = jnp.dtype(out_dtype).itemsize
    # Double-buffered in/out tiles + ~8 live lane-padded f32 intermediates/row.
    row_bytes = 2 * CD * in_sz + 2 * (CD * out_sz + K * 4) + 8 * max(CD, 128) * 4
    bw_pad, wpb = _plan_row_blocks(BW, row_bytes, budget, min_blocks)
    grid = (bw_pad // wpb,)

    # Lane-pack the C channels into the last dim and cast once in the wrapper
    # so the dominant HBM read is already half-width on the bf16 path.
    xr = x.reshape(BW, CD).astype(matmul_dtype)
    if bw_pad != BW:
        xr = jnp.pad(xr, ((0, bw_pad - BW), (0, 0)))

    # Block-diagonal / lane-tiled weights (one copy per channel lane-group).
    w13 = jnp.concatenate(
        [_block_diag(params["w1"], C), _block_diag(params["w3a"], C)], axis=1
    ).astype(matmul_dtype)                                        # (C*D, 2*C*D)
    w2 = _block_diag(params["w2"], C).astype(matmul_dtype)        # (C*D, C*K)
    w3b = jnp.tile(params["w3b"], (1, C)).astype(matmul_dtype)    # (K, C*D)
    w4 = _block_diag(params["w4"], C).astype(matmul_dtype)        # (C*D, C*D)
    b1 = jnp.tile(params["b1"], (1, C)).astype(jnp.float32)       # (1, C*D)
    b2 = jnp.tile(params["b2"], (1, C)).astype(jnp.float32)       # (1, C*K)
    b3 = jnp.tile(params["b3"], (1, C)).astype(jnp.float32)       # (1, C*D)
    b4 = jnp.tile(params["b4"], (1, C)).astype(jnp.float32)       # (1, C*D)

    def w_spec(shape):
        # Grid-invariant (constant index map): fetched once, VMEM-resident.
        return pl.BlockSpec(shape, lambda i: (0, 0))

    cost = pl.CostEstimate(
        flops=2 * bw_pad * CD * (2 * CD)       # fused x @ [w1 | w3a]
        + 2 * bw_pad * CD * CK                 # gen2
        + 2 * bw_pad * K * CD                  # core @ tiled w3b
        + 2 * bw_pad * CD * CD,                # gen4
        transcendentals=2 * bw_pad * CD + bw_pad * CK,
        bytes_accessed=bw_pad * CD * (in_sz + out_sz) + bw_pad * K * 4
        + (CD * 2 * CD + CD * CK + K * CD + CD * CD) * in_sz
        + (3 * CD + CK) * 4,
    )

    kernel = functools.partial(star2_kernel, channels=C, d_series=D, d_core=K)

    out_f, core_f = pl.pallas_call(
        kernel,
        out_shape=(
            jax.ShapeDtypeStruct((bw_pad, CD), out_dtype),
            jax.ShapeDtypeStruct((bw_pad, K), jnp.float32),
        ),
        grid_spec=pltpu.PrefetchScalarGridSpec(
            num_scalar_prefetch=0,
            grid=grid,
            in_specs=[
                pl.BlockSpec((wpb, CD), lambda i: (i, 0)),   # lane-packed x rows
                w_spec((CD, 2 * CD)),                        # [w1 | w3a] block-diag
                w_spec((1, CD)),                             # b1 (tiled)
                w_spec((CD, CK)),                            # w2 block-diag
                w_spec((1, CK)),                             # b2 (tiled)
                w_spec((K, CD)),                             # w3b lane-tiled
                w_spec((1, CD)),                             # b3 (tiled)
                w_spec((CD, CD)),                            # w4 block-diag
                w_spec((1, CD)),                             # b4 (tiled)
            ],
            out_specs=[
                pl.BlockSpec((wpb, CD), lambda i: (i, 0)),   # lane-packed output
                pl.BlockSpec((wpb, K), lambda i: (i, 0)),    # per-window core
            ],
        ),
        compiler_params=pltpu.CompilerParams(
            dimension_semantics=("parallel",),
            vmem_limit_bytes=vmem_limit,
        ),
        cost_estimate=cost,
    )(xr, w13, b1, w2, b2, w3b, b3, w4, b4)

    out = out_f[:BW].reshape(B, W, C, D)
    core = core_f[:BW].reshape(B, W, K)
    return out, core


def star2_reference(x, p):
    # Pure-JAX reference of the PyTorch eval-mode forward (f32 throughout).
    h1 = jax.nn.gelu(x @ p["w1"] + p["b1"][0], approximate=False)
    h2 = h1 @ p["w2"] + p["b2"][0]
    wgt = jax.nn.softmax(h2, axis=2)
    cm = jnp.sum(h2 * wgt, axis=2, keepdims=True)
    core = cm[:, :, 0, :]
    h3 = jax.nn.gelu(x @ p["w3a"] + cm @ p["w3b"] + p["b3"][0], approximate=False)
    out = h3 @ p["w4"] + p["b4"][0]
    return out, core


def make_params(key, d_series, d_core):
    ks = jax.random.split(key, 8)
    s = 0.1
    # Stored pre-transposed: (in_features, out_features).
    w1 = s * jax.random.normal(ks[0], (d_series, d_series), jnp.float32)
    b1 = s * jax.random.normal(ks[1], (1, d_series), jnp.float32)
    w2 = s * jax.random.normal(ks[2], (d_series, d_core), jnp.float32)
    b2 = s * jax.random.normal(ks[3], (1, d_core), jnp.float32)
    # gen3: in = d_series + d_core, split into the x-part and the core-part.
    w3 = s * jax.random.normal(ks[4], (d_series + d_core, d_series), jnp.float32)
    w3a, w3b = w3[:d_series], w3[d_series:]
    b3 = s * jax.random.normal(ks[5], (1, d_series), jnp.float32)
    w4 = s * jax.random.normal(ks[6], (d_series, d_series), jnp.float32)
    b4 = s * jax.random.normal(ks[7], (1, d_series), jnp.float32)
    return dict(w1=w1, b1=b1, w2=w2, b2=b2, w3a=w3a, w3b=w3b, b3=b3, w4=w4, b4=b4)


if __name__ == "__main__":
    # batch, num_windows, channels, d_series, d_core  (C*D = 128: lane-dense)
    B, W, C, D, K = 4, 8, 4, 32, 16
    key = jax.random.PRNGKey(0)
    kx, kp = jax.random.split(key)
    x = jax.random.normal(kx, (B, W, C, D), jnp.float32)
    params = make_params(kp, D, K)

    ref_out, ref_core = star2_reference(x, params)

    # f32-matmul path: tight check against the f32 reference.
    out32, core32 = star2_forward(x, params, matmul_dtype=jnp.float32)
    out32 = jax.block_until_ready(out32)
    core32 = jax.block_until_ready(core32)
    assert out32.shape == (B, W, C, D) and core32.shape == (B, W, K)
    assert jnp.allclose(out32, ref_out, atol=1e-5, rtol=1e-5)
    assert jnp.allclose(core32, ref_core, atol=1e-5, rtol=1e-5)

    # bf16 MXU-operand path (default fast path): looser tolerance since x and
    # the weights are rounded to bf16 while accumulation stays f32.
    outbf, corebf = star2_forward(x, params, matmul_dtype=jnp.bfloat16)
    outbf = jax.block_until_ready(outbf)
    corebf = jax.block_until_ready(corebf)
    assert outbf.shape == (B, W, C, D) and corebf.shape == (B, W, K)
    assert jnp.allclose(outbf, ref_out, atol=2e-2, rtol=2e-2)
    assert jnp.allclose(corebf, ref_core, atol=2e-2, rtol=2e-2)

    print("KERNEL_OK")
</pallas_src>

<mosaic_0001>
module attributes {stable_mosaic.version = 11 : i64} {
  func.func @star2_kernel(%arg0: i32, %arg1: memref<32x128xf32, #tpu.memory_space<vmem>>, %arg2: memref<128x256xf32, #tpu.memory_space<vmem>>, %arg3: memref<1x128xf32, #tpu.memory_space<vmem>>, %arg4: memref<128x64xf32, #tpu.memory_space<vmem>>, %arg5: memref<1x64xf32, #tpu.memory_space<vmem>>, %arg6: memref<16x128xf32, #tpu.memory_space<vmem>>, %arg7: memref<1x128xf32, #tpu.memory_space<vmem>>, %arg8: memref<128x128xf32, #tpu.memory_space<vmem>>, %arg9: memref<1x128xf32, #tpu.memory_space<vmem>>, %arg10: memref<32x128xf32, #tpu.memory_space<vmem>>, %arg11: memref<32x16xf32, #tpu.memory_space<vmem>>) attributes {dimension_semantics = [#tpu.dimension_semantics<parallel>], iteration_bounds = array<i64: 1>, scalar_prefetch = 0 : i64, scratch_operands = 0 : i64, tpu.core_type = #tpu.core_type<tc>, window_params = [{transform_indices = @transform_0, window_bounds = array<i64: 32, 128>}, {pipeline_mode = #tpu.pipeline_mode<synchronous>, transform_indices = @transform_1, window_bounds = array<i64: 128, 256>}, {pipeline_mode = #tpu.pipeline_mode<synchronous>, transform_indices = @transform_2, window_bounds = array<i64: 1, 128>}, {pipeline_mode = #tpu.pipeline_mode<synchronous>, transform_indices = @transform_3, window_bounds = array<i64: 128, 64>}, {pipeline_mode = #tpu.pipeline_mode<synchronous>, transform_indices = @transform_4, window_bounds = array<i64: 1, 64>}, {pipeline_mode = #tpu.pipeline_mode<synchronous>, transform_indices = @transform_5, window_bounds = array<i64: 16, 128>}, {pipeline_mode = #tpu.pipeline_mode<synchronous>, transform_indices = @transform_6, window_bounds = array<i64: 1, 128>}, {pipeline_mode = #tpu.pipeline_mode<synchronous>, transform_indices = @transform_7, window_bounds = array<i64: 128, 128>}, {pipeline_mode = #tpu.pipeline_mode<synchronous>, transform_indices = @transform_8, window_bounds = array<i64: 1, 128>}, {transform_indices = @transform_9, window_bounds = array<i64: 32, 128>}, {transform_indices = @transform_10, window_bounds = array<i64: 32, 16>}]} {
    %c0 = arith.constant 0 : index
    %c0_0 = arith.constant 0 : index
    %0 = vector.load %arg1[%c0, %c0_0] : memref<32x128xf32, #tpu.memory_space<vmem>>, vector<32x128xf32>
    %c0_1 = arith.constant 0 : index
    %c0_2 = arith.constant 0 : index
    %1 = vector.load %arg2[%c0_1, %c0_2] : memref<128x256xf32, #tpu.memory_space<vmem>>, vector<128x256xf32>
    %cst = arith.constant dense<0.000000e+00> : vector<32x256xf32>
    %2 = tpu.matmul %0, %1, %cst {dimension_numbers = #tpu.dot_dimension_numbers<[1], [0], [0], [1], [0, 0, 1, 1], [], []>} : vector<32x128xf32>, vector<128x256xf32>, vector<32x256xf32> -> vector<32x256xf32>
    %3 = vector.extract_strided_slice %2 {offsets = [0, 0], sizes = [32, 128], strides = [1, 1]} : vector<32x256xf32> to vector<32x128xf32>
    %c0_3 = arith.constant 0 : index
    %c0_4 = arith.constant 0 : index
    %4 = vector.load %arg3[%c0_3, %c0_4] : memref<1x128xf32, #tpu.memory_space<vmem>>, vector<1x128xf32>
    %5 = vector.broadcast %4 : vector<1x128xf32> to vector<32x128xf32>
    %6 = arith.addf %3, %5 : vector<32x128xf32>
    %cst_5 = arith.constant 5.000000e-01 : f32
    %7 = vector.broadcast %cst_5 : f32 to vector<32x128xf32>
    %8 = arith.mulf %7, %6 : vector<32x128xf32>
    %cst_6 = arith.constant 1.41421354 : f32
    %9 = vector.broadcast %cst_6 : f32 to vector<32x128xf32>
    %10 = arith.divf %6, %9 : vector<32x128xf32>
    %11 = math.erf %10 : vector<32x128xf32>
    %cst_7 = arith.constant 1.000000e+00 : f32
    %12 = vector.broadcast %cst_7 : f32 to vector<32x128xf32>
    %13 = arith.addf %12, %11 : vector<32x128xf32>
    %14 = arith.mulf %8, %13 : vector<32x128xf32>
    %15 = vector.extract_strided_slice %2 {offsets = [0, 128], sizes = [32, 128], strides = [1, 1]} : vector<32x256xf32> to vector<32x128xf32>
    %c0_8 = arith.constant 0 : index
    %c0_9 = arith.constant 0 : index
    %16 = vector.load %arg4[%c0_8, %c0_9] : memref<128x64xf32, #tpu.memory_space<vmem>>, vector<128x64xf32>
    %cst_10 = arith.constant dense<0.000000e+00> : vector<32x64xf32>
    %17 = tpu.matmul %14, %16, %cst_10 {dimension_numbers = #tpu.dot_dimension_numbers<[1], [0], [0], [1], [0, 0, 1, 1], [], []>} : vector<32x128xf32>, vector<128x64xf32>, vector<32x64xf32> -> vector<32x64xf32>
    %c0_11 = arith.constant 0 : index
    %c0_12 = arith.constant 0 : index
    %18 = vector.load %arg5[%c0_11, %c0_12] : memref<1x64xf32, #tpu.memory_space<vmem>>, vector<1x64xf32>
    %19 = vector.broadcast %18 : vector<1x64xf32> to vector<32x64xf32>
    %20 = arith.addf %17, %19 : vector<32x64xf32>
    %21 = vector.extract_strided_slice %20 {offsets = [0, 0], sizes = [32, 16], strides = [1, 1]} : vector<32x64xf32> to vector<32x16xf32>
    %22 = vector.extract_strided_slice %20 {offsets = [0, 16], sizes = [32, 16], strides = [1, 1]} : vector<32x64xf32> to vector<32x16xf32>
    %23 = vector.extract_strided_slice %20 {offsets = [0, 32], sizes = [32, 16], strides = [1, 1]} : vector<32x64xf32> to vector<32x16xf32>
    %24 = vector.extract_strided_slice %20 {offsets = [0, 48], sizes = [32, 16], strides = [1, 1]} : vector<32x64xf32> to vector<32x16xf32>
    %25 = arith.maximumf %21, %22 : vector<32x16xf32>
    %26 = arith.maximumf %25, %23 : vector<32x16xf32>
    %27 = arith.maximumf %26, %24 : vector<32x16xf32>
    %cst_13 = arith.constant 0.000000e+00 : f32
    %28 = vector.broadcast %cst_13 : f32 to vector<32x16xf32>
    %cst_14 = arith.constant 0.000000e+00 : f32
    %29 = vector.broadcast %cst_14 : f32 to vector<32x16xf32>
    %30 = arith.subf %21, %27 : vector<32x16xf32>
    %31 = math.exp %30 : vector<32x16xf32>
    %32 = arith.mulf %21, %31 : vector<32x16xf32>
    %33 = arith.addf %28, %32 : vector<32x16xf32>
    %34 = arith.addf %29, %31 : vector<32x16xf32>
    %35 = arith.subf %22, %27 : vector<32x16xf32>
    %36 = math.exp %35 : vector<32x16xf32>
    %37 = arith.mulf %22, %36 : vector<32x16xf32>
    %38 = arith.addf %33, %37 : vector<32x16xf32>
    %39 = arith.addf %34, %36 : vector<32x16xf32>
    %40 = arith.subf %23, %27 : vector<32x16xf32>
    %41 = math.exp %40 : vector<32x16xf32>
    %42 = arith.mulf %23, %41 : vector<32x16xf32>
    %43 = arith.addf %38, %42 : vector<32x16xf32>
    %44 = arith.addf %39, %41 : vector<32x16xf32>
    %45 = arith.subf %24, %27 : vector<32x16xf32>
    %46 = math.exp %45 : vector<32x16xf32>
    %47 = arith.mulf %24, %46 : vector<32x16xf32>
    %48 = arith.addf %43, %47 : vector<32x16xf32>
    %49 = arith.addf %44, %46 : vector<32x16xf32>
    %50 = arith.divf %48, %49 : vector<32x16xf32>
    %c0_15 = arith.constant 0 : index
    %c0_16 = arith.constant 0 : index
    %51 = vector.load %arg6[%c0_15, %c0_16] : memref<16x128xf32, #tpu.memory_space<vmem>>, vector<16x128xf32>
    %cst_17 = arith.constant dense<0.000000e+00> : vector<32x128xf32>
    %52 = tpu.matmul %50, %51, %cst_17 {dimension_numbers = #tpu.dot_dimension_numbers<[1], [0], [0], [1], [0, 0, 1, 1], [], []>} : vector<32x16xf32>, vector<16x128xf32>, vector<32x128xf32> -> vector<32x128xf32>
    %53 = arith.addf %15, %52 : vector<32x128xf32>
    %c0_18 = arith.constant 0 : index
    %c0_19 = arith.constant 0 : index
    %54 = vector.load %arg7[%c0_18, %c0_19] : memref<1x128xf32, #tpu.memory_space<vmem>>, vector<1x128xf32>
    %55 = vector.broadcast %54 : vector<1x128xf32> to vector<32x128xf32>
    %56 = arith.addf %53, %55 : vector<32x128xf32>
    %cst_20 = arith.constant 5.000000e-01 : f32
    %57 = vector.broadcast %cst_20 : f32 to vector<32x128xf32>
    %58 = arith.mulf %57, %56 : vector<32x128xf32>
    %cst_21 = arith.constant 1.41421354 : f32
    %59 = vector.broadcast %cst_21 : f32 to vector<32x128xf32>
    %60 = arith.divf %56, %59 : vector<32x128xf32>
    %61 = math.erf %60 : vector<32x128xf32>
    %cst_22 = arith.constant 1.000000e+00 : f32
    %62 = vector.broadcast %cst_22 : f32 to vector<32x128xf32>
    %63 = arith.addf %62, %61 : vector<32x128xf32>
    %64 = arith.mulf %58, %63 : vector<32x128xf32>
    %c0_23 = arith.constant 0 : index
    %c0_24 = arith.constant 0 : index
    %65 = vector.load %arg8[%c0_23, %c0_24] : memref<128x128xf32, #tpu.memory_space<vmem>>, vector<128x128xf32>
    %cst_25 = arith.constant dense<0.000000e+00> : vector<32x128xf32>
    %66 = tpu.matmul %64, %65, %cst_25 {dimension_numbers = #tpu.dot_dimension_numbers<[1], [0], [0], [1], [0, 0, 1, 1], [], []>} : vector<32x128xf32>, vector<128x128xf32>, vector<32x128xf32> -> vector<32x128xf32>
    %c0_26 = arith.constant 0 : index
    %c0_27 = arith.constant 0 : index
    %67 = vector.load %arg9[%c0_26, %c0_27] : memref<1x128xf32, #tpu.memory_space<vmem>>, vector<1x128xf32>
    %68 = vector.broadcast %67 : vector<1x128xf32> to vector<32x128xf32>
    %69 = arith.addf %66, %68 : vector<32x128xf32>
    %c0_28 = arith.constant 0 : index
    %c0_29 = arith.constant 0 : index
    %70 = vector.load %arg10[%c0_28, %c0_29] : memref<32x128xf32, #tpu.memory_space<vmem>>, vector<32x128xf32>
    tpu.vector_store %arg10[%c0_28, %c0_29], %69 {strides = array<i32>} : memref<32x128xf32, #tpu.memory_space<vmem>>, vector<32x128xf32>,
    %c0_30 = arith.constant 0 : index
    %c0_31 = arith.constant 0 : index
    %71 = vector.load %arg11[%c0_30, %c0_31] : memref<32x16xf32, #tpu.memory_space<vmem>>, vector<32x16xf32>
    tpu.vector_store %arg11[%c0_30, %c0_31], %50 {strides = array<i32>} : memref<32x16xf32, #tpu.memory_space<vmem>>, vector<32x16xf32>,
    return
  }
  func.func @transform_0(%arg0: i32) -> (i32, i32) {
    %c0_i32 = arith.constant 0 : i32
    %c0_i32_0 = arith.constant 0 : i32
    return %arg0, %c0_i32 : i32, i32
  }
  func.func @transform_1(%arg0: i32) -> (i32, i32) {
    %c0_i32 = arith.constant 0 : i32
    %c0_i32_0 = arith.constant 0 : i32
    %c0_i32_1 = arith.constant 0 : i32
    return %c0_i32, %c0_i32_0 : i32, i32
  }
  func.func @transform_2(%arg0: i32) -> (i32, i32) {
    %c0_i32 = arith.constant 0 : i32
    %c0_i32_0 = arith.constant 0 : i32
    %c0_i32_1 = arith.constant 0 : i32
    return %c0_i32, %c0_i32_0 : i32, i32
  }
  func.func @transform_3(%arg0: i32) -> (i32, i32) {
    %c0_i32 = arith.constant 0 : i32
    %c0_i32_0 = arith.constant 0 : i32
    %c0_i32_1 = arith.constant 0 : i32
    return %c0_i32, %c0_i32_0 : i32, i32
  }
  func.func @transform_4(%arg0: i32) -> (i32, i32) {
    %c0_i32 = arith.constant 0 : i32
    %c0_i32_0 = arith.constant 0 : i32
    %c0_i32_1 = arith.constant 0 : i32
    return %c0_i32, %c0_i32_0 : i32, i32
  }
  func.func @transform_5(%arg0: i32) -> (i32, i32) {
    %c0_i32 = arith.constant 0 : i32
    %c0_i32_0 = arith.constant 0 : i32
    %c0_i32_1 = arith.constant 0 : i32
    return %c0_i32, %c0_i32_0 : i32, i32
  }
  func.func @transform_6(%arg0: i32) -> (i32, i32) {
    %c0_i32 = arith.constant 0 : i32
    %c0_i32_0 = arith.constant 0 : i32
    %c0_i32_1 = arith.constant 0 : i32
    return %c0_i32, %c0_i32_0 : i32, i32
  }
  func.func @transform_7(%arg0: i32) -> (i32, i32) {
    %c0_i32 = arith.constant 0 : i32
    %c0_i32_0 = arith.constant 0 : i32
    %c0_i32_1 = arith.constant 0 : i32
    return %c0_i32, %c0_i32_0 : i32, i32
  }
  func.func @transform_8(%arg0: i32) -> (i32, i32) {
    %c0_i32 = arith.constant 0 : i32
    %c0_i32_0 = arith.constant 0 : i32
    %c0_i32_1 = arith.constant 0 : i32
    return %c0_i32, %c0_i32_0 : i32, i32
  }
  func.func @transform_9(%arg0: i32) -> (i32, i32) {
    %c0_i32 = arith.constant 0 : i32
    %c0_i32_0 = arith.constant 0 : i32
    return %arg0, %c0_i32 : i32, i32
  }
  func.func @transform_10(%arg0: i32) -> (i32, i32) {
    %c0_i32 = arith.constant 0 : i32
    %c0_i32_0 = arith.constant 0 : i32
    return %arg0, %c0_i32 : i32, i32
  }
}

</mosaic_0001>

<bundles_post_ra>
// kernel: tpu_custom_call.1
= control target key start
LH: loop header
LB: loop body
LE: loop exit
PB: predicated region body
PF: predicated region fallthrough
CT: control target
= control target key end

     0   :  { %16 = vsyncpa [#allocation3], 0  ;;  %s1714_s0 = inlined_call_operand.vmem [shape: f32[32,128], index: 0, kind: input, shape index: {}]   ;;  %s1715_s1 = inlined_call_operand.hbm [shape: f32[128,256], index: 1, kind: input, shape index: {}]   ;;  %s1716_s2 = inlined_call_operand.vmem [shape: f32[1,128], index: 2, kind: input, shape index: {}]   ;;  %s1717_s3 = inlined_call_operand.vmem [shape: f32[128,64], index: 3, kind: input, shape index: {}]   ;;  %s1718_s4 = inlined_call_operand.vmem [shape: f32[1,64], index: 4, kind: input, shape index: {}]   ;;  %s1719_s5 = inlined_call_operand.vmem [shape: f32[16,128], index: 5, kind: input, shape index: {}]   ;;  %s1720_s6 = inlined_call_operand.vmem [shape: f32[1,128], index: 6, kind: input, shape index: {}]   ;;  %s1721_s7 = inlined_call_operand.vmem [shape: f32[128,128], index: 7, kind: input, shape index: {}]   ;;  %s1722_s8 = inlined_call_operand.vmem [shape: f32[1,128], index: 8, kind: input, shape index: {}]   ;;  %s1723_s9 = inlined_call_operand.hbm [shape: f32[32,128], index: 9, kind: output, shape index: {0}]   ;;  %s1724_s10 = inlined_call_operand.vmem [shape: f32[32,16], index: 10, kind: output, shape index: {1}]  }
   0x1   :  { %17 = vsyncpa [#allocation4], 0  ;;  %s24_s15 = sshll.u32 %s1715_s1, 4  ;;  %s1179_s16 = smov [#allocation2]   ;;  %s25_s15 = int_to_ptr.hbm [resolvable:$true] %s24_s15 }
   0x2   :  { %s26_s17 = sshll.u32 %s1179_s16, 4  ;;  %s1180_s18 = smov 256   ;;  %s27_s17 = int_to_ptr.vmem [resolvable:$true] %s26_s17 }
   0x3   :  { %s1181_s19 = smov 16  }
   0x4   :  { %32 = dma.hbm_to_vmem [thread:$0]  %s25_s15, 4096, %s27_s17, [#allocation3], %s1180_s18, %s1180_s18, %s1181_s19  }
   0x5   :  { %1175 = dma.done.wait [#allocation3], 4096  }
   0x6   :  { %1176 = vsyncadd [#allocation3], 4294963200  ;;  %v85_v0 = vld [vmem:[#allocation2 + $0xf0] sm:$0xff]  ;;  %v83_v1 = vld [vmem:[#allocation2 + $0xe0] sm:$0xff]  ;;  %v1182_v20 = vmov 1.4142135  }
   0x7   :  { %87 = vmatpush.msra.mxu0 %v85_v0  ;;  %v81_v2 = vld [vmem:[#allocation2 + $0xd0] sm:$0xff]  ;;  %v79_v3 = vld [vmem:[#allocation2 + $0xc0] sm:$0xff]  ;;  %v1259_v17 = vld [vmem:[%s1714_s0 + $0x8] sm:$0xff]  ;;  %1069 = vrcp.f32 %v1182_v20  ;;  %s1183_s1 = smov 80   ;;  %s1185_s20 = smov 96  }
   0x8   :  { %v77_v4 = vld [vmem:[#allocation2 + $0xb0] sm:$0xff]  ;;  %v75_v5 = vld [vmem:[#allocation2 + $0xa0] sm:$0xff]  ;;  %v1271_v19 = vld [vmem:[%s1714_s0 + $0x18] sm:$0xff]  ;;  %s1187_s21 = smov 32  }
   0x9   :  { %88 = vmatpush.msra.mxu0 %v83_v1  ;;  %v73_v6 = vld [vmem:[#allocation2 + $0x90] sm:$0xff]  ;;  %v71_v7 = vld [vmem:[#allocation2 + $0x80] sm:$0xff]  ;;  %v351_v24 = vld [vmem:[%s1717_s3 + $0x78] sm:$0xff] }
   0xa   :  { %v69_v8 = vld [vmem:[#allocation2 + $0x70] sm:$0xff]  ;;  %v67_v9 = vld [vmem:[#allocation2 + $0x60] sm:$0xff]  ;;  %356 = vmatpush.msra.mxu2 %v351_v24  ;;  %v349_v27 = vld [vmem:[%s1717_s3 + $0x68] sm:$0xff] }
   0xb   :  { %89 = vmatpush.msra.mxu0 %v81_v2  ;;  %v65_v10 = vld [vmem:[#allocation2 + $0x50] sm:$0xff]  ;;  %v63_v11 = vld [vmem:[#allocation2 + $0x40] sm:$0xff]  ;;  %v347_v31 = vld [vmem:[%s1717_s3 + $0x58] sm:$0xff] }
   0xc   :  { %v61_v12 = vld [vmem:[#allocation2 + $0x30] sm:$0xff]  ;;  %v59_v13 = vld [vmem:[#allocation2 + $0x20] sm:$0xff]  ;;  %v345_v36 = vld [vmem:[%s1717_s3 + $0x48] sm:$0xff] }
   0xd   :  { %90 = vmatpush.msra.mxu0 %v79_v3  ;;  %v57_v14 = vld [vmem:[#allocation2 + $0x10] sm:$0xff]  ;;  %v55_v15 = vld [vmem:[#allocation2] sm:$0xff]  ;;  %v1070_v21 = vpop.eup %1069  ;;  %v343_v40 = vld [vmem:[%s1717_s3 + $0x38] sm:$0xff] }
   0xe   :  { %v1253_v16 = vld [vmem:[%s1714_s0] sm:$0xff]  ;;  %v1265_v18 = vld [vmem:[%s1714_s0 + $0x10] sm:$0xff]  ;;  %v158_v22 = vmul.f32 1.4142135, %v1070_v21  ;;  %vm162_vm0 = vweird.f32 %v1070_v21  ;;  %v341_v47 = vld [vmem:[%s1717_s3 + $0x28] sm:$0xff] }
   0xf   :  { %91 = vmatpush.msra.mxu0 %v77_v4  ;;  %v350_v26 = vld [vmem:[%s1717_s3 + $0x70] sm:$0xff]  ;;  %v348_v29 = vld [vmem:[%s1717_s3 + $0x60] sm:$0xff]  ;;  %v339_v55 = vld [vmem:[%s1717_s3 + $0x18] sm:$0xff] }
  0x10   :  { %v159_v23 = vsub.f32 1.0, %v158_v22  ;;  %357 = vmatpush.msra.mxu2 %v350_v26  ;;  %v1289_v30 = vld [vmem:[%s1716_s2] ss:$0 sm:$0xff]  ;;  %v346_v34 = vld [vmem:[%s1717_s3 + $0x50] sm:$0xff]  ;;  %v337_v0 = vld [vmem:[%s1717_s3 + $0x8] sm:$0xff]  ;;  %s1184_s2 = smov 112  }
  0x11   :  { %92 = vmatpush.msra.mxu0 %v75_v5  ;;  %v344_v38 = vld [vmem:[%s1717_s3 + $0x40] sm:$0xff]  ;;  %v342_v43 = vld [vmem:[%s1717_s3 + $0x30] sm:$0xff] }
  0x12   :  { %v160_v25 = vmul.f32 %v1070_v21, %v159_v23  ;;  %358 = vmatpush.msra.mxu2 %v349_v27  ;;  %v340_v51 = vld [vmem:[%s1717_s3 + $0x20] sm:$0xff]  ;;  %v338_v60 = vld [vmem:[%s1717_s3 + $0x10] sm:$0xff] }
  0x13   :  { %93 = vmatpush.msra.mxu0 %v73_v6  ;;  %v336_v5 = vld [vmem:[%s1717_s3] sm:$0xff]  ;;  %s1188_s3 = smov [#allocation5]  }
  0x14   :  { %v161_v28 = vadd.f32 %v1070_v21, %v160_v25  ;;  %359 = vmatpush.msra.mxu2 %v348_v29 }
  0x15   :  { %94 = vmatpush.msra.mxu0 %v71_v7 }
  0x16   :  { %360 = vmatpush.msra.mxu2 %v347_v31  ;;  %v1294_v33 = vsel %vm162_vm0, %v1070_v21, %v161_v28 }
  0x17   :  { %95 = vmatpush.msra.mxu0 %v69_v8 }
  0x18   :  { %361 = vmatpush.msra.mxu2 %v346_v34 }
  0x19   :  { %96 = vmatpush.msra.mxu0 %v67_v9 }
  0x1a   :  { %362 = vmatpush.msra.mxu2 %v345_v36 }
  0x1b   :  { %97 = vmatpush.msra.mxu0 %v65_v10 }
  0x1c   :  { %363 = vmatpush.msra.mxu2 %v344_v38 }
  0x1d   :  { %98 = vmatpush.msra.mxu0 %v63_v11 }
  0x1e   :  { %364 = vmatpush.msra.mxu2 %v343_v40 }
  0x1f   :  { %99 = vmatpush.msra.mxu0 %v61_v12 }
  0x20   :  { %365 = vmatpush.msra.mxu2 %v342_v43 }
  0x21   :  { %100 = vmatpush.msra.mxu0 %v59_v13 }
  0x22   :  { %366 = vmatpush.msra.mxu2 %v341_v47 }
  0x23   :  { %101 = vmatpush.msra.mxu0 %v57_v14 }
  0x24   :  { %367 = vmatpush.msra.mxu2 %v340_v51 }
  0x25   :  { %102 = vmatpush.msra.mxu0 %v55_v15 }
  0x26   :  { %103 = vmatmul.f32.vlgmr.msra.gmra.mxu0 %v1253_v16  ;;  %368 = vmatpush.msra.mxu2 %v339_v55 }
  0x28   :  { %369 = vmatpush.msra.mxu2 %v338_v60 }
  0x2a   :  { %370 = vmatpush.msra.mxu2 %v337_v0 }
  0x2c   :  { %371 = vmatpush.msra.mxu2 %v336_v5 }
  0x2e   :  { %106 = vmatmul.f32.gmra.mxu0 %v1259_v17 }
  0x36   :  { %109 = vmatmul.f32.gmra.mxu0 %v1265_v18 }
  0x3e   :  { %112 = vmatmul.f32.gmra.mxu0 %v1271_v19 }
  0xa3   :  { %v104_v32 = vpop.f32.mrf.mxu0 }
  0xa4   :  { %v1300_v35 = vadd.f32 %v1289_v30, %v104_v32 }
  0xa6   :  { %v1307_v37 = vmul.f32 %v1294_v33, %v1300_v35 }
  0xa8   :  { %v168_v39 = vmul.f32 %v1307_v37, %v1307_v37 }
  0xaa   :  { %v1317_v41 = vmin.f32 %v168_v39, 16.0 }
  0xab   :  { %v107_v42 = vpop.f32.mrf.mxu0 }
  0xac   :  { %v170_v44 = vmul.f32 2.1237322e-06, %v1317_v41  ;;  %v1324_v45 = vadd.f32 %v1289_v30, %v107_v42  ;;  %v181_v46 = vmul.f32 3.8918573e-05, %v1317_v41 }
  0xae   :  { %v171_v48 = vadd.f32 0.00028619796, %v170_v44  ;;  %v1332_v49 = vmul.f32 %v1294_v33, %v1324_v45  ;;  %v182_v50 = vadd.f32 0.001143296, %v181_v46 }
  0xb0   :  { %v172_v52 = vmul.f32 %v171_v48, %v1317_v41  ;;  %v208_v53 = vmul.f32 %v1332_v49, %v1332_v49  ;;  %v183_v54 = vmul.f32 %v182_v50, %v1317_v41 }
  0xb2   :  { %v173_v56 = vadd.f32 0.0036580483, %v172_v52  ;;  %v1344_v57 = vmin.f32 %v208_v53, 16.0  ;;  %v184_v58 = vadd.f32 0.014752088, %v183_v54 }
  0xb3   :  { %v110_v59 = vpop.f32.mrf.mxu0 }
  0xb4   :  { %v210_v61 = vmul.f32 2.1237322e-06, %v1344_v57  ;;  %v1351_v62 = vadd.f32 %v1289_v30, %v110_v59  ;;  %v185_v63 = vmul.f32 %v184_v58, %v1317_v41  ;;  %v221_v1 = vmul.f32 3.8918573e-05, %v1344_v57 }
  0xb5   :  { %v174_v2 = vmul.f32 %v173_v56, %v1317_v41 }
  0xb6   :  { %v211_v3 = vadd.f32 0.00028619796, %v210_v61  ;;  %v1361_v4 = vmul.f32 %v1294_v33, %v1351_v62  ;;  %v186_v6 = vadd.f32 0.112945676, %v185_v63  ;;  %v222_v7 = vadd.f32 0.001143296, %v221_v1 }
  0xb7   :  { %v175_v12 = vadd.f32 0.05243302, %v174_v2 }
  0xb8   :  { %v248_v8 = vmul.f32 %v1361_v4, %v1361_v4  ;;  %v212_v9 = vmul.f32 %v211_v3, %v1344_v57  ;;  %v187_v10 = vmul.f32 %v186_v6, %v1317_v41  ;;  %v223_v11 = vmul.f32 %v222_v7, %v1344_v57 }
  0xb9   :  { %v176_v27 = vmul.f32 %v175_v12, %v1317_v41 }
  0xba   :  { %v1371_v13 = vmin.f32 %v248_v8, 16.0  ;;  %v188_v15 = vadd.f32 0.4994258, %v187_v10  ;;  %v224_v20 = vadd.f32 0.014752088, %v223_v11 }
  0xbb   :  { %v113_v14 = vpop.f32.mrf.mxu0  ;;  %v213_v23 = vadd.f32 0.0036580483, %v212_v9  ;;  %v177_v38 = vadd.f32 0.18741608, %v176_v27 }
  0xbc   :  { %v250_v21 = vmul.f32 2.1237322e-06, %v1371_v13  ;;  %v1375_v22 = vadd.f32 %v1289_v30, %v113_v14  ;;  %v189_v24 = vmul.f32 %v188_v15, %v1317_v41  ;;  %v225_v25 = vmul.f32 %v224_v20, %v1344_v57 }
  0xbd   :  { %v261_v26 = vmul.f32 3.8918573e-05, %v1371_v13  ;;  %v214_v36 = vmul.f32 %v213_v23, %v1344_v57  ;;  %v178_v51 = vmul.f32 %v177_v38, %v1317_v41 }
  0xbe   :  { %v251_v28 = vadd.f32 0.00028619796, %v250_v21  ;;  %v1383_v29 = vmul.f32 %v1294_v33, %v1375_v22  ;;  %v190_v31 = vadd.f32 1.0, %v189_v24  ;;  %v226_v32 = vadd.f32 0.112945676, %v225_v25 }
  0xbf   :  { %v262_v34 = vadd.f32 0.001143296, %v261_v26  ;;  %v215_v47 = vadd.f32 0.05243302, %v214_v36  ;;  %v179_v1 = vadd.f32 1.1283791, %v178_v51 }
  0xc0   :  { %v288_v30 = vmul.f32 %v1383_v29, %v1383_v29  ;;  %1071 = vrcp.f32 %v190_v31  ;;  %v227_v40 = vmul.f32 %v226_v32, %v1344_v57  ;;  %v252_v42 = vmul.f32 %v251_v28, %v1371_v13 }
  0xc1   :  { %v263_v43 = vmul.f32 %v262_v34, %v1371_v13  ;;  %v216_v60 = vmul.f32 %v215_v47, %v1344_v57  ;;  %v202_v5 = vand.u32 2147483648, %v190_v31  ;;  %v200_v7 = vand.u32 2147483647, %v190_v31 }
  0xc2   :  { %v1388_v39 = vmin.f32 %v288_v30, 16.0  ;;  %v228_v46 = vadd.f32 0.4994258, %v227_v40  ;;  %v253_v54 = vadd.f32 0.0036580483, %v252_v42  ;;  %vm196_vm2 = vweird.f32 %v190_v31 }
  0xc3   :  { %v264_v48 = vadd.f32 0.014752088, %v263_v43  ;;  %v217_v9 = vadd.f32 0.18741608, %v216_v60  ;;  %v203_v20 = vor.u32 1.1754944e-38, %v202_v5  ;;  %v180_v23 = vmul.f32 %v179_v1, %v1307_v37 }
  0xc4   :  { %v290_v44 = vmul.f32 2.1237322e-06, %v1388_v39  ;;  %v301_v50 = vmul.f32 3.8918573e-05, %v1388_v39  ;;  %v229_v52 = vmul.f32 %v228_v46, %v1344_v57  ;;  %v254_v3 = vmul.f32 %v253_v54, %v1371_v13 }
  0xc5   :  { %v265_v56 = vmul.f32 %v264_v48, %v1371_v13  ;;  %vm201_vm4 = vcmp.eq.f32.partialorder %v200_v7, 8.507059e+37  ;;  %v218_v27 = vmul.f32 %v217_v9, %v1344_v57  ;;  %v153_v37 = vmul.f32 0.5, %v1300_v35 }
  0xc6   :  { %v1072_v53 = vpop.eup %1071  ;;  %v291_v55 = vadd.f32 0.00028619796, %v290_v44  ;;  %v302_v58 = vadd.f32 0.001143296, %v301_v50  ;;  %v230_v61 = vadd.f32 1.0, %v229_v52  ;;  %v154_v5 = vmul.f32 0.5, %v1324_v45 }
  0xc7   :  { %v192_v59 = vmul.f32 %v1072_v53, %v190_v31  ;;  %v266_v63 = vadd.f32 0.112945676, %v265_v56  ;;  %vm197_vm1 = vweird.f32 %v1072_v53  ;;  %v255_v14 = vadd.f32 0.05243302, %v254_v3 }
  0xc8   :  { %v303_v0 = vmul.f32 %v302_v58, %v1388_v39  ;;  %v292_v41 = vmul.f32 %v291_v55, %v1388_v39  ;;  %1073 = vrcp.f32 %v230_v61  ;;  %vm198_vm3 = vmor %vm196_vm2, %vm197_vm1  ;;  %v219_v44 = vadd.f32 1.1283791, %v218_v27 }
  0xc9   :  { %v193_v2 = vsub.f32 1.0, %v192_v59  ;;  %v267_v8 = vmul.f32 %v266_v63, %v1371_v13  ;;  %v256_v30 = vmul.f32 %v255_v14, %v1371_v13  ;;  %v240_v46 = vand.u32 2147483647, %v230_v61 }
  0xca   :  { %v304_v10 = vadd.f32 0.014752088, %v303_v0  ;;  %v293_v15 = vadd.f32 0.0036580483, %v292_v41  ;;  %v242_v47 = vand.u32 2147483648, %v230_v61  ;;  %vm236_vm6 = vweird.f32 %v230_v61 }
  0xcb   :  { %v194_v6 = vmul.f32 %v1072_v53, %v193_v2  ;;  %v268_v12 = vadd.f32 0.4994258, %v267_v8  ;;  %v257_v51 = vadd.f32 0.18741608, %v256_v30  ;;  %v220_v35 = vmul.f32 %v219_v44, %v1332_v49 }
  0xcc   :  { %v305_v21 = vmul.f32 %v304_v10, %v1388_v39  ;;  %v294_v36 = vmul.f32 %v293_v15, %v1388_v39  ;;  %v243_v56 = vor.u32 1.1754944e-38, %v242_v47  ;;  %vm241_vm8 = vcmp.eq.f32.partialorder %v240_v46, 8.507059e+37 }
  0xcd   :  { %v195_v11 = vadd.f32 %v1072_v53, %v194_v6  ;;  %v269_v25 = vmul.f32 %v268_v12, %v1371_v13  ;;  %v258_v63 = vmul.f32 %v257_v51, %v1371_v13  ;;  %v156_v44 = vmul.f32 0.5, %v1375_v22 }
  0xce   :  { %v1074_v26 = vpop.eup %1073  ;;  %v306_v32 = vadd.f32 0.112945676, %v305_v21  ;;  %v295_v52 = vadd.f32 0.05243302, %v294_v36 }
  0xcf   :  { %v199_v24 = vsel %vm198_vm3, %v1072_v53, %v195_v11  ;;  %v232_v31 = vmul.f32 %v1074_v26, %v230_v61  ;;  %v270_v38 = vadd.f32 1.0, %v269_v25  ;;  %vm237_vm5 = vweird.f32 %v1074_v26 }
  0xd0   :  { %v204_v28 = vsel %vm201_vm4, %v203_v20, %v199_v24  ;;  %v307_v40 = vmul.f32 %v306_v32, %v1388_v39  ;;  %vm238_vm7 = vmor %vm236_vm6, %vm237_vm5  ;;  %v296_v0 = vmul.f32 %v295_v52, %v1388_v39  ;;  %v259_v6 = vadd.f32 1.1283791, %v258_v63 }
  0xd1   :  { %v205_v34 = vmul.f32 %v204_v28, %v180_v23  ;;  %v233_v43 = vsub.f32 1.0, %v232_v31  ;;  %1075 = vrcp.f32 %v270_v38  ;;  %v282_v49 = vand.u32 2147483648, %v270_v38 }
  0xd2   :  { %v308_v50 = vadd.f32 0.4994258, %v307_v40  ;;  %v297_v7 = vadd.f32 0.18741608, %v296_v0  ;;  %v280_v10 = vand.u32 2147483647, %v270_v38  ;;  %vm276_vm10 = vweird.f32 %v270_v38 }
  0xd3   :  { %v1041_v42 = vclamps-f32 %v205_v34, 1.0  ;;  %v234_v48 = vmul.f32 %v1074_v26, %v233_v43  ;;  %v283_v15 = vor.u32 1.1754944e-38, %v282_v49  ;;  %v260_v21 = vmul.f32 %v259_v6, %v1361_v4 }
  0xd4   :  { %v309_v55 = vmul.f32 %v308_v50, %v1388_v39  ;;  %v298_v14 = vmul.f32 %v297_v7, %v1388_v39  ;;  %vm281_vm12 = vcmp.eq.f32.partialorder %v280_v10, 8.507059e+37  ;;  %v155_v39 = vmul.f32 0.5, %v1351_v62  ;;  %v1066_v62 = vld [vmem:[%s1718_s4] ss:$0 sm:$0xff]  ;;  %s1186_s4 = smov 48  }
  0xd5   :  { %v328_v57 = vadd.f32 1.0, %v1041_v42  ;;  %v235_v54 = vadd.f32 %v1074_v26, %v234_v48  ;;  %vm731_vm5 = vcmask 130048  }
  0xd6   :  { %v310_v59 = vadd.f32 1.0, %v309_v55  ;;  %v299_v27 = vadd.f32 1.1283791, %v298_v14 }
  0xd7   :  { %v332_v53 = vmul.f32 %v328_v57, %v153_v37  ;;  %v239_v58 = vsel %vm238_vm7, %v1074_v26, %v235_v54  ;;  %v1076_v60 = vpop.eup %1075 }
  0xd8   :  { %v244_v1 = vsel %vm241_vm8, %v243_v56, %v239_v58  ;;  %v272_v3 = vmul.f32 %v1076_v60, %v270_v38  ;;  %1077 = vrcp.f32 %v310_v59  ;;  %vm277_vm9 = vweird.f32 %v1076_v60 }
  0xd9   :  { %372 = vmatmul.f32.vlgmr.msra.gmra.mxu2 %v332_v53  ;;  %v245_v2 = vmul.f32 %v244_v1, %v220_v35  ;;  %vm278_vm11 = vmor %vm276_vm10, %vm277_vm9  ;;  %v322_v26 = vand.u32 2147483648, %v310_v59  ;;  %v320_v32 = vand.u32 2147483647, %v310_v59  ;;  %vm316_vm14 = vweird.f32 %v310_v59 }
  0xda   :  { %v273_v41 = vsub.f32 1.0, %v272_v3  ;;  %v300_v4 = vmul.f32 %v299_v27, %v1383_v29 }
  0xdb   :  { %v1042_v61 = vclamps-f32 %v245_v2, 1.0  ;;  %v323_v36 = vor.u32 1.1754944e-38, %v322_v26  ;;  %vm321_vm0 = vcmp.eq.f32.partialorder %v320_v32, 8.507059e+37 }
  0xdc   :  { %v274_v9 = vmul.f32 %v1076_v60, %v273_v41 }
  0xdd   :  { %v329_v8 = vadd.f32 1.0, %v1042_v61 }
  0xde   :  { %v1078_v11 = vpop.eup %1077  ;;  %v275_v13 = vadd.f32 %v1076_v60, %v274_v9 }
  0xdf   :  { %v333_v12 = vmul.f32 %v329_v8, %v154_v5  ;;  %v312_v20 = vmul.f32 %v1078_v11, %v310_v59  ;;  %vm317_vm13 = vweird.f32 %v1078_v11 }
  0xe0   :  { %v279_v45 = vsel %vm278_vm11, %v1076_v60, %v275_v13  ;;  %vm318_vm15 = vmor %vm316_vm14, %vm317_vm13 }
  0xe1   :  { %375 = vmatmul.f32.gmra.mxu2 %v333_v12  ;;  %v284_v23 = vsel %vm281_vm12, %v283_v15, %v279_v45  ;;  %v313_v24 = vsub.f32 1.0, %v312_v20 }
  0xe2   :  { %v285_v25 = vmul.f32 %v284_v23, %v260_v21 }
  0xe3   :  { %v314_v28 = vmul.f32 %v1078_v11, %v313_v24 }
  0xe4   :  { %v1043_v34 = vclamps-f32 %v285_v25, 1.0 }
  0xe5   :  { %v315_v31 = vadd.f32 %v1078_v11, %v314_v28 }
  0xe6   :  { %v330_v30 = vadd.f32 1.0, %v1043_v34 }
  0xe7   :  { %v319_v38 = vsel %vm318_vm15, %v1078_v11, %v315_v31 }
  0xe8   :  { %v334_v40 = vmul.f32 %v330_v30, %v155_v39  ;;  %v324_v37 = vsel %vm321_vm0, %v323_v36, %v319_v38 }
  0xe9   :  { %v325_v42 = vmul.f32 %v324_v37, %v300_v4 }
  0xea   :  { %378 = vmatmul.f32.gmra.mxu2 %v334_v40 }
  0xeb   :  { %v1044_v43 = vclamps-f32 %v325_v42, 1.0 }
  0xed   :  { %v331_v46 = vadd.f32 1.0, %v1044_v43 }
  0xef   :  { %v335_v47 = vmul.f32 %v331_v46, %v156_v44 }
  0xf2   :  { %381 = vmatmul.f32.gmra.mxu2 %v335_v47 }
 0x15c   :  { %v373_v57 = vpop.f32.mrf.mxu2 }
 0x15d   :  { %v1424_v48 = vadd.f32 %v1066_v62, %v373_v57 }
 0x15f   :  { %421 = vrot.lane.b32.xlu1 %v1424_v48, %s1183_s1  ;;  %389 = vrot.lane.b32.xlu0 %v1424_v48, %s1184_s2 }
 0x164   :  { %v376_v29 = vpop.f32.mrf.mxu2 }
 0x165   :  { %v1430_v22 = vadd.f32 %v1066_v62, %v376_v29 }
 0x167   :  { %405 = vrot.lane.b32.xlu0 %v1424_v48, %s1185_s20  ;;  %407 = vrot.lane.b32.xlu2 %v1430_v22, %s1185_s20 }
 0x168   :  { %391 = vrot.lane.b32.xlu1 %v1430_v22, %s1184_s2 }
 0x16d   :  { %v379_v50 = vpop.f32.mrf.mxu2 }
 0x16e   :  { %v1438_v51 = vadd.f32 %v1066_v62, %v379_v50 }
 0x16f   :  { %423 = vrot.lane.b32.xlu2 %v1430_v22, %s1183_s1 }
 0x170   :  { %409 = vrot.lane.b32.xlu1 %v1438_v51, %s1185_s20  ;;  %393 = vrot.lane.b32.xlu0 %v1438_v51, %s1184_s2 }
 0x175   :  { %v382_v52 = vpop.f32.mrf.mxu2 }
 0x176   :  { %v1446_v53 = vadd.f32 %v1066_v62, %v382_v52 }
 0x177   :  { %425 = vrot.lane.b32.xlu2 %v1438_v51, %s1183_s1 }
 0x178   :  { %411 = vrot.lane.b32.xlu1 %v1446_v53, %s1185_s20  ;;  %395 = vrot.lane.b32.xlu0 %v1446_v53, %s1184_s2 }
 0x17f   :  { %427 = vrot.lane.b32.xlu2 %v1446_v53, %s1183_s1 }
 0x1c1   :  { %v408_v56 = vpop.permute.xlu2 %407 }
 0x1c9   :  { %v424_v1 = vpop.permute.xlu2 %423 }
 0x1d1   :  { %v422_v54 = vpop.permute.xlu1 %421  ;;  %v390_v55 = vpop.permute.xlu0 %389 }
 0x1d2   :  { %v401_v35 = vmax.f32 %v1424_v48, %v390_v55  ;;  %v426_v7 = vpop.permute.xlu2 %425 }
 0x1d9   :  { %v406_v58 = vpop.permute.xlu0 %405 }
 0x1da   :  { %v417_v59 = vmax.f32 %v401_v35, %v406_v58  ;;  %v392_v60 = vpop.permute.xlu1 %391  ;;  %v428_v12 = vpop.permute.xlu2 %427 }
 0x1db   :  { %v402_v0 = vmax.f32 %v1430_v22, %v392_v60 }
 0x1dc   :  { %v1457_v63 = vmax.f32 %v417_v59, %v422_v54 }
 0x1dd   :  { %v418_v2 = vmax.f32 %v402_v0, %v408_v56 }
 0x1de   :  { %601 = vrot.lane.b32.xlu2 %v1457_v63, %s1186_s4  ;;  %533 = vrot.lane.b32.xlu1 %v1457_v63, %s1187_s21 }
 0x1df   :  { %465 = vrot.lane.b32.xlu0 %v1457_v63, %s1181_s19  ;;  %v1464_v3 = vmax.f32 %v418_v2, %v424_v1 }
 0x1e2   :  { %v410_v61 = vpop.permute.xlu1 %409  ;;  %v394_v41 = vpop.permute.xlu0 %393 }
 0x1e3   :  { %v403_v5 = vmax.f32 %v1438_v51, %v394_v41 }
 0x1e5   :  { %v419_v6 = vmax.f32 %v403_v5, %v410_v61 }
 0x1e6   :  { %603 = vrot.lane.b32.xlu2 %v1464_v3, %s1186_s4  ;;  %535 = vrot.lane.b32.xlu1 %v1464_v3, %s1187_s21 }
 0x1e7   :  { %467 = vrot.lane.b32.xlu0 %v1464_v3, %s1181_s19  ;;  %v1471_v49 = vmax.f32 %v419_v6, %v426_v7 }
 0x1ea   :  { %v396_v8 = vpop.permute.xlu0 %395  ;;  %v412_v10 = vpop.permute.xlu1 %411 }
 0x1eb   :  { %v404_v9 = vmax.f32 %v1446_v53, %v396_v8 }
 0x1ed   :  { %v420_v11 = vmax.f32 %v404_v9, %v412_v10 }
 0x1ee   :  { %605 = vrot.lane.b32.xlu2 %v1471_v49, %s1186_s4  ;;  %537 = vrot.lane.b32.xlu1 %v1471_v49, %s1187_s21 }
 0x1ef   :  { %469 = vrot.lane.b32.xlu0 %v1471_v49, %s1181_s19  ;;  %v1478_v13 = vmax.f32 %v420_v11, %v428_v12 }
 0x1f6   :  { %607 = vrot.lane.b32.xlu2 %v1478_v13, %s1186_s4  ;;  %539 = vrot.lane.b32.xlu1 %v1478_v13, %s1187_s21 }
 0x1f7   :  { %471 = vrot.lane.b32.xlu0 %v1478_v13, %s1181_s19 }
 0x238   :  { %v602_v14 = vpop.permute.xlu2 %601 }
 0x239   :  { %v613_v15 = vsub.f32 %v1424_v48, %v602_v14 }
 0x23b   :  { %v617_v20 = vmul.f32 1.442695, %v613_v15 }
 0x23d   :  { %1079 = vpow2.f32 %v617_v20 }
 0x240   :  { %v604_v21 = vpop.permute.xlu2 %603 }
 0x241   :  { %v614_v23 = vsub.f32 %v1430_v22, %v604_v21 }
 0x243   :  { %v1080_v45 = vpop.eup %1079  ;;  %v619_v24 = vmul.f32 1.442695, %v614_v23 }
 0x244   :  { %653 = vrot.lane.b32.xlu2 %v1080_v45, %s1183_s1  ;;  %v625_v25 = vmul.f32 %v1080_v45, %v1424_v48 }
 0x245   :  { %1081 = vpow2.f32 %v619_v24 }
 0x248   :  { %v606_v52 = vpop.permute.xlu2 %605 }
 0x249   :  { %v615_v1 = vsub.f32 %v1438_v51, %v606_v52 }
 0x24b   :  { %v1082_v34 = vpop.eup %1081  ;;  %v621_v61 = vmul.f32 1.442695, %v615_v1 }
 0x24c   :  { %633 = vrot.lane.b32.xlu2 %v625_v25, %s1183_s1  ;;  %v626_v11 = vmul.f32 %v1082_v34, %v1430_v22 }
 0x250   :  { %v534_v26 = vpop.permute.xlu1 %533  ;;  %v608_v41 = vpop.permute.xlu2 %607 }
 0x251   :  { %v545_v27 = vsub.f32 %v1424_v48, %v534_v26  ;;  %v466_v28 = vpop.permute.xlu0 %465  ;;  %v616_v9 = vsub.f32 %v1446_v53, %v608_v41 }
 0x252   :  { %v477_v32 = vsub.f32 %v1424_v48, %v466_v28  ;;  %v84_v28 = vld [vmem:[#allocation2 + $0xe8] sm:$0xff] }
 0x253   :  { %v549_v31 = vmul.f32 1.442695, %v545_v27  ;;  %v623_v10 = vmul.f32 1.442695, %v616_v9  ;;  %v86_v27 = vld [vmem:[#allocation2 + $0xf8] sm:$0xff] }
 0x254   :  { %v481_v39 = vmul.f32 1.442695, %v477_v32  ;;  %655 = vrot.lane.b32.xlu2 %v1082_v34, %s1183_s1  ;;  %116 = vmatpush.msra.mxu1 %v86_v27  ;;  %v82_v32 = vld [vmem:[#allocation2 + $0xd8] sm:$0xff]  ;;  %v80_v34 = vld [vmem:[#allocation2 + $0xc8] sm:$0xff] }
 0x255   :  { %1083 = vpow2.f32 %v549_v31  ;;  %v78_v31 = vld [vmem:[#allocation2 + $0xb8] sm:$0xff] }
 0x256   :  { %1085 = vpow2.f32 %v481_v39  ;;  %117 = vmatpush.msra.mxu1 %v84_v28  ;;  %v76_v39 = vld [vmem:[#allocation2 + $0xa8] sm:$0xff] }
 0x258   :  { %v536_v30 = vpop.permute.xlu1 %535  ;;  %118 = vmatpush.msra.mxu1 %v82_v32 }
 0x259   :  { %v468_v36 = vpop.permute.xlu0 %467  ;;  %v546_v38 = vsub.f32 %v1430_v22, %v536_v30  ;;  %v74_v30 = vld [vmem:[#allocation2 + $0x98] sm:$0xff] }
 0x25a   :  { %v478_v37 = vsub.f32 %v1430_v22, %v468_v36  ;;  %119 = vmatpush.msra.mxu1 %v80_v34  ;;  %v72_v36 = vld [vmem:[#allocation2 + $0x88] sm:$0xff] }
 0x25b   :  { %v1084_v4 = vpop.eup %1083  ;;  %v551_v42 = vmul.f32 1.442695, %v546_v38  ;;  %v70_v38 = vld [vmem:[#allocation2 + $0x78] sm:$0xff] }
 0x25c   :  { %585 = vrot.lane.b32.xlu1 %v1084_v4, %s1185_s20  ;;  %v1086_v40 = vpop.eup %1085  ;;  %v483_v62 = vmul.f32 1.442695, %v478_v37  ;;  %v557_v29 = vmul.f32 %v1084_v4, %v1424_v48  ;;  %120 = vmatpush.msra.mxu1 %v78_v31  ;;  %v437_v4 = vsub.f32 %v1424_v48, %v1457_v63  ;;  %v729_v63 = vld [vmem:[%s1719_s5] sm:$0xff] }
 0x25d   :  { %517 = vrot.lane.b32.xlu0 %v1086_v40, %s1184_s2  ;;  %v489_v47 = vmul.f32 %v1086_v40, %v1424_v48  ;;  %1087 = vpow2.f32 %v551_v42  ;;  %v68_v40 = vld [vmem:[#allocation2 + $0x68] sm:$0xff]  ;;  %v66_v42 = vld [vmem:[#allocation2 + $0x58] sm:$0xff] }
 0x25e   :  { %121 = vmatpush.msra.mxu1 %v76_v39  ;;  %v441_v37 = vmul.f32 1.442695, %v437_v4 }
 0x260   :  { %v538_v43 = vpop.permute.xlu1 %537  ;;  %122 = vmatpush.msra.mxu1 %v74_v30 }
 0x261   :  { %v547_v44 = vsub.f32 %v1438_v51, %v538_v43  ;;  %v470_v46 = vpop.permute.xlu0 %469  ;;  %v64_v43 = vld [vmem:[#allocation2 + $0x48] sm:$0xff] }
 0x262   :  { %v479_v50 = vsub.f32 %v1438_v51, %v470_v46  ;;  %123 = vmatpush.msra.mxu1 %v72_v36 }
 0x263   :  { %v553_v57 = vmul.f32 1.442695, %v547_v44  ;;  %v1088_v56 = vpop.eup %1087  ;;  %v730_v44 = vld [vmem:[%s1719_s5 + $0x8] sm:$0xff] }
 0x264   :  { %497 = vrot.lane.b32.xlu1 %v489_v47, %s1184_s2  ;;  %v485_v58 = vmul.f32 1.442695, %v479_v50  ;;  %v558_v21 = vmul.f32 %v1088_v56, %v1430_v22  ;;  %124 = vmatpush.msra.mxu1 %v70_v38  ;;  %v62_v47 = vld [vmem:[#allocation2 + $0x38] sm:$0xff]  ;;  %v56_v50 = vld [vmem:[#allocation2 + $0x8] sm:$0xff] }
 0x265   :  { %1089 = vpow2.f32 %v553_v57  ;;  %565 = vrot.lane.b32.xlu0 %v557_v29, %s1185_s20  ;;  %758 = vmatpush.msra.mxu3 %v730_v44  ;;  %v58_v57 = vld [vmem:[#allocation2 + $0x18] sm:$0xff] }
 0x266   :  { %1091 = vpow2.f32 %v483_v62  ;;  %125 = vmatpush.msra.mxu1 %v68_v40  ;;  %v60_v62 = vld [vmem:[#allocation2 + $0x28] sm:$0xff] }
 0x267   :  { %759 = vmatpush.msra.mxu3 %v729_v63 }
 0x268   :  { %v540_v54 = vpop.permute.xlu1 %539  ;;  %126 = vmatpush.msra.mxu1 %v66_v42 }
 0x269   :  { %v548_v55 = vsub.f32 %v1446_v53, %v540_v54  ;;  %v472_v60 = vpop.permute.xlu0 %471 }
 0x26a   :  { %v480_v2 = vsub.f32 %v1446_v53, %v472_v60  ;;  %127 = vmatpush.msra.mxu1 %v64_v43 }
 0x26b   :  { %v1090_v35 = vpop.eup %1089  ;;  %v555_v59 = vmul.f32 1.442695, %v548_v55 }
 0x26c   :  { %589 = vrot.lane.b32.xlu2 %v1090_v35, %s1185_s20  ;;  %587 = vrot.lane.b32.xlu1 %v1088_v56, %s1185_s20  ;;  %v1092_v0 = vpop.eup %1091  ;;  %v487_v7 = vmul.f32 1.442695, %v480_v2  ;;  %v559_v23 = vmul.f32 %v1090_v35, %v1438_v51  ;;  %v438_v35 = vsub.f32 %v1430_v22, %v1464_v3  ;;  %v439_v2 = vsub.f32 %v1438_v51, %v1471_v49 }
 0x26d   :  { %1093 = vpow2.f32 %v555_v59  ;;  %519 = vrot.lane.b32.xlu0 %v1092_v0, %s1184_s2  ;;  %v490_v5 = vmul.f32 %v1092_v0, %v1430_v22  ;;  %128 = vmatpush.msra.mxu1 %v62_v47  ;;  %v440_v49 = vsub.f32 %v1446_v53, %v1478_v13 }
 0x26e   :  { %1095 = vpow2.f32 %v485_v58  ;;  %v443_v0 = vmul.f32 1.442695, %v438_v35 }
 0x26f   :  { %1097 = vpow2.f32 %v621_v61  ;;  %129 = vmatpush.msra.mxu1 %v60_v62  ;;  %v447_v27 = vmul.f32 1.442695, %v440_v49 }
 0x270   :  { %1099 = vpow2.f32 %v487_v7 }
 0x271   :  { %1101 = vpow2.f32 %v623_v10  ;;  %130 = vmatpush.msra.mxu1 %v58_v57 }
 0x272   :  { %1103 = vpow2.f32 %v441_v37 }
 0x273   :  { %v1094_v6 = vpop.eup %1093  ;;  %131 = vmatpush.msra.mxu1 %v56_v50 }
 0x274   :  { %591 = vrot.lane.b32.xlu2 %v1094_v6, %s1185_s20  ;;  %499 = vrot.lane.b32.xlu1 %v490_v5, %s1184_s2  ;;  %v1096_v8 = vpop.eup %1095  ;;  %v560_v25 = vmul.f32 %v1094_v6, %v1446_v53  ;;  %v445_v6 = vmul.f32 1.442695, %v439_v2 }
 0x275   :  { %521 = vrot.lane.b32.xlu0 %v1096_v8, %s1184_s2  ;;  %v1098_v12 = vpop.eup %1097  ;;  %v491_v24 = vmul.f32 %v1096_v8, %v1438_v51  ;;  %132 = vmatmul.f32.vlgmr.msra.gmra.mxu1 %v1253_v16 }
 0x276   :  { %v1100_v14 = vpop.eup %1099  ;;  %v627_v15 = vmul.f32 %v1098_v12, %v1438_v51 }
 0x277   :  { %v1102_v20 = vpop.eup %1101  ;;  %v492_v26 = vmul.f32 %v1100_v14, %v1446_v53 }
 0x278   :  { %v628_v45 = vmul.f32 %v1102_v20, %v1446_v53  ;;  %v1104_v52 = vpop.eup %1103 }
 0x279   :  { %v449_v41 = vmul.f32 %v1104_v52, %v1424_v48 }
 0x27c   :  { %635 = vrot.lane.b32.xlu2 %v626_v11, %s1183_s1  ;;  %657 = vrot.lane.b32.xlu1 %v1098_v12, %s1183_s1 }
 0x27d   :  { %523 = vrot.lane.b32.xlu0 %v1100_v14, %s1184_s2  ;;  %135 = vmatmul.f32.gmra.mxu1 %v1259_v17 }
 0x284   :  { %637 = vrot.lane.b32.xlu2 %v627_v15, %s1183_s1  ;;  %659 = vrot.lane.b32.xlu1 %v1102_v20, %s1183_s1 }
 0x285   :  { %567 = vrot.lane.b32.xlu0 %v558_v21, %s1185_s20  ;;  %138 = vmatmul.f32.gmra.mxu1 %v1265_v18 }
 0x28c   :  { %639 = vrot.lane.b32.xlu2 %v628_v45, %s1183_s1  ;;  %569 = vrot.lane.b32.xlu1 %v559_v23, %s1185_s20 }
 0x28d   :  { %501 = vrot.lane.b32.xlu0 %v491_v24, %s1184_s2  ;;  %141 = vmatmul.f32.gmra.mxu1 %v1271_v19 }
 0x294   :  { %571 = vrot.lane.b32.xlu1 %v560_v25, %s1185_s20  ;;  %s1190_s20 = smov 8  }
 0x295   :  { %503 = vrot.lane.b32.xlu0 %v492_v26, %s1184_s2  ;;  %s1024_s2 = sshll.u32 %s1723_s9, 4  ;;  %s1025_s2 = int_to_ptr.hbm [resolvable:$true] %s1024_s2 }
 0x29e   :  { %v654_v46 = vpop.permute.xlu2 %653 }
 0x2a6   :  { %v634_v56 = vpop.permute.xlu2 %633 }
 0x2ae   :  { %v656_v61 = vpop.permute.xlu2 %655 }
 0x2c6   :  { %v590_v20 = vpop.permute.xlu2 %589 }
 0x2ce   :  { %v586_v29 = vpop.permute.xlu1 %585  ;;  %v592_v30 = vpop.permute.xlu2 %591 }
 0x2cf   :  { %v518_v54 = vpop.permute.xlu0 %517 }
 0x2d0   :  { %v529_v55 = vadd.f32 %v1104_v52, %v518_v54 }
 0x2d2   :  { %v597_v58 = vadd.f32 %v586_v29, %v529_v55 }
 0x2d4   :  { %v665_v59 = vadd.f32 %v654_v46, %v597_v58 }
 0x2d6   :  { %v498_v60 = vpop.permute.xlu1 %497  ;;  %1105 = vrcp.f32 %v665_v59  ;;  %v680_v12 = vand.u32 2147483648, %v665_v59  ;;  %v678_v17 = vand.u32 2147483647, %v665_v59  ;;  %vm674_vm2 = vweird.f32 %v665_v59  ;;  %v636_v54 = vpop.permute.xlu2 %635 }
 0x2d7   :  { %v566_v1 = vpop.permute.xlu0 %565  ;;  %1107 = vpow2.f32 %v443_v0  ;;  %v509_v3 = vadd.f32 %v498_v60, %v449_v41 }
 0x2d8   :  { %1109 = vpow2.f32 %v445_v6  ;;  %v681_v23 = vor.u32 1.1754944e-38, %v680_v12  ;;  %vm679_vm4 = vcmp.eq.f32.partialorder %v678_v17, 8.507059e+37 }
 0x2d9   :  { %v577_v14 = vadd.f32 %v566_v1, %v509_v3 }
 0x2db   :  { %v645_v24 = vadd.f32 %v634_v56, %v577_v14 }
 0x2dc   :  { %v1106_v5 = vpop.eup %1105 }
 0x2dd   :  { %v670_v16 = vmul.f32 %v1106_v5, %v665_v59  ;;  %v1108_v8 = vpop.eup %1107  ;;  %vm675_vm1 = vweird.f32 %v1106_v5 }
 0x2de   :  { %v588_v7 = vpop.permute.xlu1 %587  ;;  %vm676_vm3 = vmor %vm674_vm2, %vm675_vm1  ;;  %v1110_v28 = vpop.eup %1109  ;;  %v450_v46 = vmul.f32 %v1108_v8, %v1430_v22 }
 0x2df   :  { %v520_v9 = vpop.permute.xlu0 %519  ;;  %v671_v10 = vsub.f32 1.0, %v670_v16  ;;  %v451_v41 = vmul.f32 %v1110_v28, %v1438_v51 }
 0x2e0   :  { %v530_v11 = vadd.f32 %v1108_v8, %v520_v9 }
 0x2e1   :  { %v672_v15 = vmul.f32 %v1106_v5, %v671_v10  ;;  %v638_v10 = vpop.permute.xlu2 %637 }
 0x2e2   :  { %v598_v48 = vadd.f32 %v588_v7, %v530_v11 }
 0x2e3   :  { %v673_v21 = vadd.f32 %v1106_v5, %v672_v15 }
 0x2e4   :  { %v666_v45 = vadd.f32 %v656_v61, %v598_v48 }
 0x2e5   :  { %v677_v26 = vsel %vm676_vm3, %v1106_v5, %v673_v21 }
 0x2e6   :  { %v500_v25 = vpop.permute.xlu1 %499  ;;  %1111 = vrcp.f32 %v666_v45  ;;  %v682_v13 = vsel %vm679_vm4, %v681_v23, %v677_v26  ;;  %v695_v57 = vand.u32 2147483648, %v666_v45  ;;  %vm689_vm7 = vweird.f32 %v666_v45 }
 0x2e7   :  { %v522_v32 = vpop.permute.xlu0 %521  ;;  %v683_v34 = vmul.f32 %v682_v13, %v645_v24  ;;  %1113 = vpow2.f32 %v447_v27  ;;  %v510_v29 = vadd.f32 %v500_v25, %v450_v46  ;;  %v693_v52 = vand.u32 2147483647, %v666_v45 }
 0x2e8   :  { %v531_v31 = vadd.f32 %v1110_v28, %v522_v32  ;;  %v696_v60 = vor.u32 1.1754944e-38, %v695_v57 }
 0x2e9   :  { %1045 = vmatmul.msk.f32.vlgmr.msra.gmra.mxu3 %vm731_vm5, %v683_v34  ;;  %1014 = vst.msk [vmem:[%s1724_s10] sm:$0xff] %vm731_vm5, %v683_v34  ;;  %vm694_vm9 = vcmp.eq.f32.partialorder %v693_v52, 8.507059e+37  ;;  %v967_v52 = vld [vmem:[%s1721_s7 + $0x30] sm:$0xff] }
 0x2ea   :  { %v599_v39 = vadd.f32 %v590_v20, %v531_v31 }
 0x2ec   :  { %v1112_v18 = vpop.eup %1111 }
 0x2ed   :  { %v685_v4 = vmul.f32 %v1112_v18, %v666_v45  ;;  %v1114_v40 = vpop.eup %1113  ;;  %vm690_vm6 = vweird.f32 %v1112_v18 }
 0x2ee   :  { %v658_v36 = vpop.permute.xlu1 %657  ;;  %vm691_vm8 = vmor %vm689_vm7, %vm690_vm6  ;;  %v452_v51 = vmul.f32 %v1114_v40, %v1446_v53  ;;  %v640_v53 = vpop.permute.xlu2 %639 }
 0x2ef   :  { %v667_v38 = vadd.f32 %v658_v36, %v599_v39  ;;  %v524_v37 = vpop.permute.xlu0 %523  ;;  %v686_v42 = vsub.f32 1.0, %v685_v4  ;;  %v975_v39 = vld [vmem:[%s1721_s7 + $0x70] sm:$0xff]  ;;  %v974_v36 = vld [vmem:[%s1721_s7 + $0x68] sm:$0xff]  ;;  %v1586_v4 = vld [vmem:[%s1720_s6] ss:$0 sm:$0xff] }
 0x2f0   :  { %v532_v43 = vadd.f32 %v1114_v40, %v524_v37  ;;  %v973_v40 = vld [vmem:[%s1721_s7 + $0x60] sm:$0xff] }
 0x2f1   :  { %1115 = vrcp.f32 %v667_v38  ;;  %v687_v44 = vmul.f32 %v1112_v18, %v686_v42  ;;  %v710_v16 = vand.u32 2147483648, %v667_v38  ;;  %vm704_vm11 = vweird.f32 %v667_v38  ;;  %v972_v42 = vld [vmem:[%s1721_s7 + $0x58] sm:$0xff] }
 0x2f2   :  { %v600_v47 = vadd.f32 %v592_v30, %v532_v43  ;;  %v708_v9 = vand.u32 2147483647, %v667_v38  ;;  %v133_v30 = vpop.f32.mrf.mxu1 }
 0x2f3   :  { %v688_v63 = vadd.f32 %v1112_v18, %v687_v44  ;;  %v711_v14 = vor.u32 1.1754944e-38, %v710_v16  ;;  %v971_v44 = vld [vmem:[%s1721_s7 + $0x50] sm:$0xff]  ;;  %v961_v16 = vld [vmem:[%s1721_s7] sm:$0xff] }
 0x2f4   :  { %vm709_vm13 = vcmp.eq.f32.partialorder %v708_v9, 8.507059e+37 }
 0x2f5   :  { %v692_v58 = vsel %vm691_vm8, %v1112_v18, %v688_v63  ;;  %v976_v18 = vld [vmem:[%s1721_s7 + $0x78] sm:$0xff] }
 0x2f6   :  { %v660_v62 = vpop.permute.xlu1 %659  ;;  %v697_v0 = vsel %vm694_vm9, %v696_v60, %v692_v58  ;;  %981 = vmatpush.msrb.mxu3 %v976_v18  ;;  %v964_v60 = vld [vmem:[%s1721_s7 + $0x18] sm:$0xff] }
 0x2f7   :  { %v1116_v19 = vpop.eup %1115  ;;  %v668_v50 = vadd.f32 %v660_v62, %v600_v47  ;;  %v568_v56 = vpop.permute.xlu0 %567  ;;  %v970_v47 = vld [vmem:[%s1721_s7 + $0x48] sm:$0xff]  ;;  %v969_v62 = vld [vmem:[%s1721_s7 + $0x40] sm:$0xff] }
 0x2f8   :  { %v700_v55 = vmul.f32 %v1116_v19, %v667_v38  ;;  %v578_v35 = vadd.f32 %v568_v56, %v510_v29  ;;  %vm705_vm10 = vweird.f32 %v1116_v19  ;;  %982 = vmatpush.msrb.mxu3 %v975_v39  ;;  %v966_v56 = vld [vmem:[%s1721_s7 + $0x28] sm:$0xff] }
 0x2f9   :  { %1117 = vrcp.f32 %v668_v50  ;;  %vm706_vm12 = vmor %vm704_vm11, %vm705_vm10  ;;  %v725_v23 = vand.u32 2147483648, %v668_v50  ;;  %vm719_vm15 = vweird.f32 %v668_v50  ;;  %v723_v25 = vand.u32 2147483647, %v668_v50 }
 0x2fa   :  { %v701_v59 = vsub.f32 1.0, %v700_v55  ;;  %v646_v22 = vadd.f32 %v636_v54, %v578_v35  ;;  %983 = vmatpush.msrb.mxu3 %v974_v36 }
 0x2fb   :  { %v726_v13 = vor.u32 1.1754944e-38, %v725_v23  ;;  %vm724_vm1 = vcmp.eq.f32.partialorder %v723_v25, 8.507059e+37 }
 0x2fc   :  { %v702_v1 = vmul.f32 %v1116_v19, %v701_v59  ;;  %v698_v2 = vmul.f32 %v697_v0, %v646_v22  ;;  %984 = vmatpush.msrb.mxu3 %v973_v40  ;;  %v965_v59 = vld [vmem:[%s1721_s7 + $0x20] sm:$0xff] }
 0x2fe   :  { %1046 = vmatmul.msk.f32.gmra.mxu3 %vm731_vm5, %v698_v2  ;;  %1015 = vst.msk [vmem:[%s1724_s10 + $0x8] sm:$0xff] %vm731_vm5, %v698_v2  ;;  %v703_v5 = vadd.f32 %v1116_v19, %v702_v1  ;;  %v570_v3 = vpop.permute.xlu1 %569  ;;  %v963_v1 = vld [vmem:[%s1721_s7 + $0x10] sm:$0xff]  ;;  %v136_v2 = vpop.f32.mrf.mxu1 }
 0x2ff   :  { %v1118_v61 = vpop.eup %1117  ;;  %v502_v7 = vpop.permute.xlu0 %501  ;;  %985 = vmatpush.msrb.mxu3 %v972_v42 }
 0x300   :  { %v715_v6 = vmul.f32 %v1118_v61, %v668_v50  ;;  %v511_v8 = vadd.f32 %v502_v7, %v451_v41  ;;  %v707_v49 = vsel %vm706_vm12, %v1116_v19, %v703_v5  ;;  %vm720_vm14 = vweird.f32 %v1118_v61  ;;  %v968_v19 = vld [vmem:[%s1721_s7 + $0x38] sm:$0xff]  ;;  %v962_v5 = vld [vmem:[%s1721_s7 + $0x8] sm:$0xff] }
 0x301   :  { %v712_v48 = vsel %vm709_vm13, %v711_v14, %v707_v49  ;;  %vm721_vm0 = vmor %vm719_vm15, %vm720_vm14  ;;  %986 = vmatpush.msrb.mxu3 %v971_v44 }
 0x302   :  { %v716_v11 = vsub.f32 1.0, %v715_v6  ;;  %v579_v12 = vadd.f32 %v570_v3, %v511_v8 }
 0x303   :  { %987 = vmatpush.msrb.mxu3 %v970_v47 }
 0x304   :  { %v717_v15 = vmul.f32 %v1118_v61, %v716_v11  ;;  %v647_v17 = vadd.f32 %v638_v10, %v579_v12 }
 0x305   :  { %988 = vmatpush.msrb.mxu3 %v969_v62 }
 0x306   :  { %v713_v20 = vmul.f32 %v712_v48, %v647_v17  ;;  %v718_v21 = vadd.f32 %v1118_v61, %v717_v15  ;;  %v572_v26 = vpop.permute.xlu1 %571  ;;  %v139_v49 = vpop.f32.mrf.mxu1 }
 0x307   :  { %v504_v45 = vpop.permute.xlu0 %503  ;;  %989 = vmatpush.msrb.mxu3 %v968_v19 }
 0x308   :  { %v512_v24 = vadd.f32 %v504_v45, %v452_v51  ;;  %1047 = vmatmul.msk.f32.gmra.mxu3 %vm731_vm5, %v713_v20  ;;  %1016 = vst.msk [vmem:[%s1724_s10 + $0x10] sm:$0xff] %vm731_vm5, %v713_v20  ;;  %v722_v28 = vsel %vm721_vm0, %v1118_v61, %v718_v21 }
 0x309   :  { %v727_v34 = vsel %vm724_vm1, %v726_v13, %v722_v28  ;;  %990 = vmatpush.msrb.mxu3 %v967_v52 }
 0x30a   :  { %v580_v27 = vadd.f32 %v572_v26, %v512_v24 }
 0x30b   :  { %991 = vmatpush.msrb.mxu3 %v966_v56 }
 0x30c   :  { %v648_v32 = vadd.f32 %v640_v53, %v580_v27 }
 0x30d   :  { %992 = vmatpush.msrb.mxu3 %v965_v59 }
 0x30e   :  { %v728_v31 = vmul.f32 %v727_v34, %v648_v32 }
 0x30f   :  { %993 = vmatpush.msrb.mxu3 %v964_v60 }
 0x310   :  { %1048 = vmatmul.msk.f32.gmra.mxu3 %vm731_vm5, %v728_v31  ;;  %1017 = vst.msk [vmem:[%s1724_s10 + $0x18] sm:$0xff] %vm731_vm5, %v728_v31  ;;  %v142_v31 = vpop.f32.mrf.mxu1  ;;  %s1022_s10 = sshll.u32 %s1188_s3, 4  ;;  %s1023_s10 = int_to_ptr.vmem [resolvable:$true] %s1022_s10 }
 0x311   :  { %994 = vmatpush.msrb.mxu3 %v963_v1 }
 0x313   :  { %995 = vmatpush.msrb.mxu3 %v962_v5 }
 0x315   :  { %996 = vmatpush.msrb.mxu3 %v961_v16 }
 0x36c   :  { %v761_v38 = vpop.f32.mrf.mxu3 }
 0x36d   :  { %v773_v37 = vadd.f32 %v761_v38, %v133_v30 }
 0x36f   :  { %v1595_v43 = vadd.f32 %v1586_v4, %v773_v37 }
 0x371   :  { %v1602_v46 = vmul.f32 %v1595_v43, %v1294_v33 }
 0x373   :  { %v793_v63 = vmul.f32 %v1602_v46, %v1602_v46 }
 0x375   :  { %v794_v57 = vmin.f32 %v793_v63, 16.0 }
 0x377   :  { %v795_v29 = vmul.f32 2.1237322e-06, %v794_v57  ;;  %v806_v50 = vmul.f32 3.8918573e-05, %v794_v57 }
 0x379   :  { %v796_v54 = vadd.f32 0.00028619796, %v795_v29  ;;  %v807_v55 = vadd.f32 0.001143296, %v806_v50 }
 0x37b   :  { %v797_v35 = vmul.f32 %v796_v54, %v794_v57  ;;  %v808_v58 = vmul.f32 %v807_v55, %v794_v57 }
 0x37d   :  { %v798_v22 = vadd.f32 0.0036580483, %v797_v35  ;;  %v809_v0 = vadd.f32 0.014752088, %v808_v58 }
 0x37f   :  { %v810_v61 = vmul.f32 %v809_v0, %v794_v57  ;;  %v799_v41 = vmul.f32 %v798_v22, %v794_v57 }
 0x381   :  { %v764_v6 = vpop.f32.mrf.mxu3  ;;  %v811_v3 = vadd.f32 0.112945676, %v810_v61  ;;  %v800_v9 = vadd.f32 0.05243302, %v799_v41 }
 0x382   :  { %v774_v7 = vadd.f32 %v764_v6, %v136_v2 }
 0x383   :  { %v812_v8 = vmul.f32 %v811_v3, %v794_v57  ;;  %v801_v15 = vmul.f32 %v800_v9, %v794_v57 }
 0x384   :  { %v1637_v10 = vadd.f32 %v1586_v4, %v774_v7 }
 0x385   :  { %v813_v11 = vadd.f32 0.4994258, %v812_v8  ;;  %v802_v21 = vadd.f32 0.18741608, %v801_v15  ;;  %v785_v15 = vmul.f32 0.5, %v1595_v43 }
 0x386   :  { %v1641_v12 = vmul.f32 %v1637_v10, %v1294_v33 }
 0x387   :  { %v814_v14 = vmul.f32 %v813_v11, %v794_v57  ;;  %v803_v28 = vmul.f32 %v802_v21, %v794_v57 }
 0x388   :  { %v833_v17 = vmul.f32 %v1641_v12, %v1641_v12 }
 0x389   :  { %v815_v48 = vadd.f32 1.0, %v814_v14  ;;  %v804_v40 = vadd.f32 1.1283791, %v803_v28 }
 0x38a   :  { %v1645_v51 = vmin.f32 %v833_v17, 16.0 }
 0x38b   :  { %v767_v20 = vpop.f32.mrf.mxu3  ;;  %1119 = vrcp.f32 %v815_v48  ;;  %v825_v47 = vand.u32 2147483647, %v815_v48  ;;  %v827_v63 = vand.u32 2147483648, %v815_v48  ;;  %vm821_vm3 = vweird.f32 %v815_v48 }
 0x38c   :  { %v775_v45 = vadd.f32 %v767_v20, %v139_v49  ;;  %v835_v23 = vmul.f32 2.1237322e-06, %v1645_v51  ;;  %v846_v24 = vmul.f32 3.8918573e-05, %v1645_v51  ;;  %v805_v58 = vmul.f32 %v804_v40, %v1602_v46 }
 0x38d   :  { %vm826_vm5 = vcmp.eq.f32.partialorder %v825_v47, 8.507059e+37 }
 0x38e   :  { %v1650_v25 = vadd.f32 %v1586_v4, %v775_v45  ;;  %v836_v26 = vadd.f32 0.00028619796, %v835_v23  ;;  %v847_v27 = vadd.f32 0.001143296, %v846_v24 }
 0x390   :  { %v1654_v53 = vmul.f32 %v1650_v25, %v1294_v33  ;;  %v837_v13 = vmul.f32 %v836_v26, %v1645_v51  ;;  %v848_v32 = vmul.f32 %v847_v27, %v1645_v51 }
 0x391   :  { %v1120_v34 = vpop.eup %1119 }
 0x392   :  { %v873_v18 = vmul.f32 %v1654_v53, %v1654_v53  ;;  %v817_v39 = vmul.f32 %v1120_v34, %v815_v48  ;;  %v838_v30 = vadd.f32 0.0036580483, %v837_v13  ;;  %v849_v38 = vadd.f32 0.014752088, %v848_v32 }
 0x393   :  { %v770_v36 = vpop.f32.mrf.mxu3  ;;  %vm822_vm2 = vweird.f32 %v1120_v34 }
 0x394   :  { %v1660_v37 = vmin.f32 %v873_v18, 16.0  ;;  %v776_v42 = vadd.f32 %v770_v36, %v142_v31  ;;  %v818_v44 = vsub.f32 1.0, %v817_v39  ;;  %v850_v62 = vmul.f32 %v849_v38, %v1645_v51  ;;  %vm823_vm4 = vmor %vm821_vm3, %vm822_vm2 }
 0x395   :  { %v839_v29 = vmul.f32 %v838_v30, %v1645_v51 }
 0x396   :  { %v1664_v57 = vadd.f32 %v1586_v4, %v776_v42  ;;  %v819_v19 = vmul.f32 %v1120_v34, %v818_v44  ;;  %v875_v50 = vmul.f32 2.1237322e-06, %v1660_v37  ;;  %v851_v52 = vadd.f32 0.112945676, %v850_v62 }
 0x397   :  { %v886_v54 = vmul.f32 3.8918573e-05, %v1660_v37  ;;  %v828_v4 = vor.u32 1.1754944e-38, %v827_v63  ;;  %v840_v1 = vadd.f32 0.05243302, %v839_v29 }
 0x398   :  { %v1671_v55 = vmul.f32 %v1664_v57, %v1294_v33  ;;  %v820_v56 = vadd.f32 %v1120_v34, %v819_v19  ;;  %v876_v35 = vadd.f32 0.00028619796, %v875_v50  ;;  %v852_v59 = vmul.f32 %v851_v52, %v1645_v51 }
 0x399   :  { %v887_v60 = vadd.f32 0.001143296, %v886_v54  ;;  %v841_v16 = vmul.f32 %v840_v1, %v1645_v51 }
 0x39a   :  { %v913_v22 = vmul.f32 %v1671_v55, %v1671_v55  ;;  %v824_v0 = vsel %vm823_vm4, %v1120_v34, %v820_v56  ;;  %v853_v33 = vadd.f32 0.4994258, %v852_v59  ;;  %v877_v61 = vmul.f32 %v876_v35, %v1660_v37 }
 0x39b   :  { %v829_v2 = vsel %vm826_vm5, %v828_v4, %v824_v0  ;;  %v888_v41 = vmul.f32 %v887_v60, %v1660_v37  ;;  %v842_v21 = vadd.f32 0.18741608, %v841_v16 }
 0x39c   :  { %v1680_v5 = vmin.f32 %v913_v22, 16.0  ;;  %v830_v46 = vmul.f32 %v829_v2, %v805_v58  ;;  %v854_v6 = vmul.f32 %v853_v33, %v1645_v51  ;;  %v878_v11 = vadd.f32 0.0036580483, %v877_v61 }
 0x39d   :  { %v889_v3 = vadd.f32 0.014752088, %v888_v41  ;;  %v843_v13 = vmul.f32 %v842_v21, %v1645_v51 }
 0x39e   :  { %v1049_v7 = vclamps-f32 %v830_v46, 1.0  ;;  %v915_v8 = vmul.f32 2.1237322e-06, %v1680_v5  ;;  %v855_v9 = vadd.f32 1.0, %v854_v6  ;;  %v926_v14 = vmul.f32 3.8918573e-05, %v1680_v5 }
 0x39f   :  { %v890_v49 = vmul.f32 %v889_v3, %v1660_v37  ;;  %v879_v23 = vmul.f32 %v878_v11, %v1660_v37  ;;  %v844_v38 = vadd.f32 1.1283791, %v843_v13  ;;  %v786_v6 = vmul.f32 0.5, %v1637_v10 }
 0x3a0   :  { %v953_v17 = vadd.f32 1.0, %v1049_v7  ;;  %v916_v48 = vadd.f32 0.00028619796, %v915_v8  ;;  %1121 = vrcp.f32 %v855_v9  ;;  %v927_v24 = vadd.f32 0.001143296, %v926_v14 }
 0x3a1   :  { %v891_v45 = vadd.f32 0.112945676, %v890_v49  ;;  %v880_v34 = vadd.f32 0.05243302, %v879_v23  ;;  %v865_v44 = vand.u32 2147483647, %v855_v9  ;;  %vm861_vm7 = vweird.f32 %v855_v9 }
 0x3a2   :  { %v957_v20 = vmul.f32 %v953_v17, %v785_v15  ;;  %v917_v27 = vmul.f32 %v916_v48, %v1680_v5  ;;  %v928_v28 = vmul.f32 %v927_v24, %v1680_v5  ;;  %v867_v47 = vand.u32 2147483648, %v855_v9 }
 0x3a3   :  { %v892_v26 = vmul.f32 %v891_v45, %v1660_v37  ;;  %v881_v63 = vmul.f32 %v880_v34, %v1660_v37  ;;  %v845_v35 = vmul.f32 %v844_v38, %v1641_v12  ;;  %vm866_vm9 = vcmp.eq.f32.partialorder %v865_v44, 8.507059e+37 }
 0x3a4   :  { %997 = vmatmul.f32.vlgmr.msrb.gmra.mxu3 %v957_v20  ;;  %v929_v31 = vadd.f32 0.014752088, %v928_v28  ;;  %v918_v30 = vadd.f32 0.0036580483, %v917_v27  ;;  %v868_v52 = vor.u32 1.1754944e-38, %v867_v47  ;;  %v787_v13 = vmul.f32 0.5, %v1650_v25 }
 0x3a5   :  { %v893_v32 = vadd.f32 0.4994258, %v892_v26  ;;  %v882_v54 = vadd.f32 0.18741608, %v881_v63  ;;  %v1068_v25 = vld [vmem:[%s1722_s8] ss:$0 sm:$0xff] }
 0x3a6   :  { %v1122_v43 = vpop.eup %1121  ;;  %v930_v36 = vmul.f32 %v929_v31, %v1680_v5  ;;  %v919_v51 = vmul.f32 %v918_v30, %v1680_v5  ;;  %s1189_s8 = smov 128  }
 0x3a7   :  { %v857_v18 = vmul.f32 %v1122_v43, %v855_v9  ;;  %v894_v39 = vmul.f32 %v893_v32, %v1660_v37  ;;  %vm862_vm6 = vweird.f32 %v1122_v43  ;;  %v883_v1 = vmul.f32 %v882_v54, %v1660_v37 }
 0x3a8   :  { %v931_v62 = vadd.f32 0.112945676, %v930_v36  ;;  %vm863_vm8 = vmor %vm861_vm7, %vm862_vm6  ;;  %v920_v4 = vadd.f32 0.05243302, %v919_v51  ;;  %v788_v36 = vmul.f32 0.5, %v1664_v57 }
 0x3a9   :  { %v858_v40 = vsub.f32 1.0, %v857_v18  ;;  %v895_v42 = vadd.f32 1.0, %v894_v39  ;;  %v884_v7 = vadd.f32 1.1283791, %v883_v1 }
 0x3aa   :  { %v932_v29 = vmul.f32 %v931_v62, %v1680_v5  ;;  %v921_v41 = vmul.f32 %v920_v4, %v1680_v5 }
 0x3ab   :  { %v859_v19 = vmul.f32 %v1122_v43, %v858_v40  ;;  %1123 = vrcp.f32 %v895_v42  ;;  %v907_v3 = vand.u32 2147483648, %v895_v42  ;;  %v905_v8 = vand.u32 2147483647, %v895_v42 }
 0x3ac   :  { %v933_v56 = vadd.f32 0.4994258, %v932_v29  ;;  %v922_v11 = vadd.f32 0.18741608, %v921_v41  ;;  %vm901_vm11 = vweird.f32 %v895_v42  ;;  %v885_v15 = vmul.f32 %v884_v7, %v1654_v53 }
 0x3ad   :  { %v860_v50 = vadd.f32 %v1122_v43, %v859_v19  ;;  %v908_v37 = vor.u32 1.1754944e-38, %v907_v3  ;;  %vm906_vm13 = vcmp.eq.f32.partialorder %v905_v8, 8.507059e+37 }
 0x3ae   :  { %v934_v60 = vmul.f32 %v933_v56, %v1680_v5  ;;  %v923_v10 = vmul.f32 %v922_v11, %v1680_v5 }
 0x3af   :  { %v864_v58 = vsel %vm863_vm8, %v1122_v43, %v860_v50 }
 0x3b0   :  { %v869_v59 = vsel %vm866_vm9, %v868_v52, %v864_v58  ;;  %v935_v33 = vadd.f32 1.0, %v934_v60  ;;  %v924_v26 = vadd.f32 1.1283791, %v923_v10 }
 0x3b1   :  { %v1124_v22 = vpop.eup %1123  ;;  %v870_v0 = vmul.f32 %v869_v59, %v845_v35 }
 0x3b2   :  { %v897_v2 = vmul.f32 %v1124_v22, %v895_v42  ;;  %1125 = vrcp.f32 %v935_v33  ;;  %vm902_vm10 = vweird.f32 %v1124_v22  ;;  %v947_v24 = vand.u32 2147483648, %v935_v33 }
 0x3b3   :  { %v1050_v61 = vclamps-f32 %v870_v0, 1.0  ;;  %vm903_vm12 = vmor %vm901_vm11, %vm902_vm10  ;;  %v945_v28 = vand.u32 2147483647, %v935_v33  ;;  %vm941_vm15 = vweird.f32 %v935_v33  ;;  %v925_v31 = vmul.f32 %v924_v26, %v1671_v55 }
 0x3b4   :  { %v898_v46 = vsub.f32 1.0, %v897_v2  ;;  %v948_v34 = vor.u32 1.1754944e-38, %v947_v24 }
 0x3b5   :  { %v954_v12 = vadd.f32 1.0, %v1050_v61  ;;  %vm946_vm1 = vcmp.eq.f32.partialorder %v945_v28, 8.507059e+37 }
 0x3b6   :  { %v899_v16 = vmul.f32 %v1124_v22, %v898_v46 }
 0x3b7   :  { %v958_v9 = vmul.f32 %v954_v12, %v786_v6 }
 0x3b8   :  { %v900_v49 = vadd.f32 %v1124_v22, %v899_v16  ;;  %v1126_v14 = vpop.eup %1125 }
 0x3b9   :  { %1000 = vmatmul.f32.gmra.mxu3 %v958_v9  ;;  %v937_v20 = vmul.f32 %v1126_v14, %v935_v33  ;;  %vm942_vm14 = vweird.f32 %v1126_v14 }
 0x3ba   :  { %v904_v17 = vsel %vm903_vm12, %v1124_v22, %v900_v49  ;;  %vm943_vm0 = vmor %vm941_vm15, %vm942_vm14 }
 0x3bb   :  { %v909_v48 = vsel %vm906_vm13, %v908_v37, %v904_v17  ;;  %v938_v45 = vsub.f32 1.0, %v937_v20 }
 0x3bc   :  { %v910_v21 = vmul.f32 %v909_v48, %v885_v15 }
 0x3bd   :  { %v939_v27 = vmul.f32 %v1126_v14, %v938_v45 }
 0x3be   :  { %v1051_v23 = vclamps-f32 %v910_v21, 1.0 }
 0x3bf   :  { %v940_v43 = vadd.f32 %v1126_v14, %v939_v27 }
 0x3c0   :  { %v955_v32 = vadd.f32 1.0, %v1051_v23 }
 0x3c1   :  { %v944_v5 = vsel %vm943_vm0, %v1126_v14, %v940_v43 }
 0x3c2   :  { %v959_v53 = vmul.f32 %v955_v32, %v787_v13  ;;  %v949_v18 = vsel %vm946_vm1, %v948_v34, %v944_v5 }
 0x3c3   :  { %v950_v39 = vmul.f32 %v949_v18, %v925_v31 }
 0x3c4   :  { %1003 = vmatmul.f32.gmra.mxu3 %v959_v53 }
 0x3c5   :  { %v1052_v30 = vclamps-f32 %v950_v39, 1.0 }
 0x3c7   :  { %v956_v38 = vadd.f32 1.0, %v1052_v30 }
 0x3c9   :  { %v960_v40 = vmul.f32 %v956_v38, %v788_v36 }
 0x3cc   :  { %1006 = vmatmul.f32.gmra.mxu3 %v960_v40 }
 0x427   :  { %v998_v42 = vpop.f32.mrf.mxu3 }
 0x428   :  { %v999_v44 = vadd.f32 %v1068_v25, %v998_v42 }
 0x42a   :  { %1010 = vst [vmem:[#allocation5] sm:$0xff] %v999_v44 }
 0x43c   :  { %v1001_v47 = vpop.f32.mrf.mxu3 }
 0x43d   :  { %v1002_v55 = vadd.f32 %v1068_v25, %v1001_v47 }
 0x43f   :  { %1011 = vst [vmem:[#allocation5 + $0x8] sm:$0xff] %v1002_v55 }
 0x447   :  { %v1004_v63 = vpop.f32.mrf.mxu3 }
 0x448   :  { %v1005_v62 = vadd.f32 %v1068_v25, %v1004_v63 }
 0x44a   :  { %1012 = vst [vmem:[#allocation5 + $0x10] sm:$0xff] %v1005_v62 }
 0x44f   :  { %v1007_v57 = vpop.f32.mrf.mxu3 }
 0x450   :  { %v1008_v19 = vadd.f32 %v1068_v25, %v1007_v57 }
 0x452   :  { %1013 = vst [vmem:[#allocation5 + $0x18] sm:$0xff] %v1008_v19 }
 0x453   :  { %1030 = dma.vmem_to_hbm [thread:$0]  %s1023_s10, 512, %s1025_s2, [#allocation4], %s1189_s8, %s1189_s8, %s1190_s20  }
 0x454   :  { %1177 = dma.done.wait [#allocation4], 512  }
 0x455   :  { %1178 = vsyncadd [#allocation4], 4294966784 }
 0x456   :  { %1039 = vsyncpa [#allocation3], 1 }
 0x457   :  { %1040 = vsyncpa [#allocation4], 1 }

</bundles_post_ra>
